<compile_context>
chip_gen: v7x
topology: tpu7x:2x2x1
jax: 0.10.0
libtpu: 0.0.40
codegen_flags: <defaults>
</compile_context>

<pallas_src>
import math

import jax
import jax.numpy as jnp
from jax.experimental import pallas as pl
from jax.experimental.pallas import tpu as pltpu

# --- SNN hyper-parameters (static, closed over by the kernel) ---------------
DT = 1.0
B_J0 = 0.01
R_M = 1.0
BETA = 1.8                        # isAdapt = 1 in mem_update_adp
MATMUL_DTYPE = jnp.bfloat16       # bf16 weights/inputs, f32 accumulation


# ---------------------------------------------------------------------------
# Chip / tiling heuristics
# ---------------------------------------------------------------------------
def _chip_info():
    """Best-effort chip query: (num_tensorcores, physical VMEM bytes)."""
    kind = ""
    try:
        kind = jax.devices()[0].device_kind.lower()
    except Exception:
        pass
    is_v7x = ("v7" in kind) or ("7x" in kind)
    # v7x (and v4 / v5p megacore) expose 2 TensorCores per chip; v5e/v6e have 1.
    num_tc = 2 if (is_v7x or "v4" in kind or "v5p" in kind) else 1
    vmem_cap = (64 << 20) if is_v7x else (128 << 20)
    try:  # prefer the real hardware query when available
        vmem_cap = int(pltpu.get_tpu_info().vmem_capacity_bytes)
    except Exception:
        pass
    return num_tc, vmem_cap


def _pick_batch_tile(batch, num_tc):
    # Single-TC chips (v5e/v6e): nb=1 — splitting the batch only repeats the
    # serial T loop and starves the MXU M dimension.
    # Dual-TC chips (v7x): exactly 2 tiles, one per core, if sublane-aligned.
    if num_tc >= 2 and batch % 16 == 0:
        return batch // 2
    return batch


def _pick_time_chunk(T, bb, size_in, size_out, vmem_cap):
    """Largest divisor of T (<=32) whose chunk buffers fit in ~1/4 of VMEM."""
    wbytes = jnp.dtype(MATMUL_DTYPE).itemsize
    budget = vmem_cap // 4
    best = 1
    for cand in range(1, min(T, 32) + 1):
        if T % cand:
            continue
        chunk_bytes = (2 * cand * bb * size_in * wbytes      # x chunk (2 bufs)
                       + 2 * cand * bb * size_out * 4        # spike_seq chunk (2 bufs)
                       + cand * bb * size_out * 4)           # in-kernel ff intermediate
        if chunk_bytes <= budget:
            best = cand
    return best


# ---------------------------------------------------------------------------
# Fused kernel: per grid step, compute the feed-forward projection for a whole
# T-chunk with one lane-dense matmul, then run TCHUNK serial adaptive-LIF
# recurrence steps.  State (mem/spike/b) lives in VMEM scratch across chunks;
# W_in / W_rec / decay vectors are grid-invariant and stay resident.
# ---------------------------------------------------------------------------
def _snn_scan_kernel(x_ref, w_in_ref, w_rec_ref, bias_ref,
                     alpha_ref, om_alpha_ref, ro_ref, om_ro_ref,
                     mem0_ref, spike0_ref, b0_ref,
                     spike_seq_ref, mem_out_ref, spike_out_ref, b_out_ref,
                     mem_s, spike_s, b_s):
    c = pl.program_id(1)
    tchunk, bb, size_in = x_ref.shape

    @pl.when(c == 0)
    def _init():
        mem_s[...] = mem0_ref[...]
        spike_s[...] = spike0_ref[...]
        b_s[...] = b0_ref[...]

    # Hoisted feed-forward projection for the whole chunk (no recurrence):
    # one big [tchunk*bb, size_in] x [size_in, size_out] MXU matmul.
    x2d = x_ref[...].reshape(tchunk * bb, size_in)
    ff = jnp.dot(x2d, w_in_ref[...], preferred_element_type=jnp.float32)
    ff = ff + bias_ref[...]                    # b_in + b_rec folded together

    alpha = alpha_ref[...]
    om_alpha = om_alpha_ref[...]
    ro = ro_ref[...]
    om_ro = om_ro_ref[...]

    mem = mem_s[...]
    spike = spike_s[...]
    b = b_s[...]

    # Serial recurrence, statically unrolled over the chunk.  Only the
    # spike @ W_rec matmul is on the dependency chain.
    # TODO(synk): for small size_out, hold W_rec in MXU staging registers via
    # pltpu.matmul_push_rhs / matmul_acc_lhs across the whole loop.
    for s in range(tchunk):
        rec = jnp.dot(spike.astype(w_rec_ref.dtype), w_rec_ref[...],
                      preferred_element_type=jnp.float32)
        inp = ff[s * bb:(s + 1) * bb] + rec

        # mem_update_adp (float32 elementwise on the VPU)
        b = ro * b + om_ro * spike                         # uses old spike
        big_b = B_J0 + BETA * b
        mem = mem * alpha + om_alpha * R_M * inp - big_b * spike * DT
        spike = (mem - big_b > 0.0).astype(jnp.float32)    # ActFun_adp forward
        spike_seq_ref[s] = spike

    mem_s[...] = mem
    spike_s[...] = spike
    b_s[...] = b

    @pl.when(c == pl.num_programs(1) - 1)
    def _finalize():
        mem_out_ref[...] = mem
        spike_out_ref[...] = spike
        b_out_ref[...] = b


def snn_layer_forward_sequence(x_seq, params, state):
    """x_seq: [T, batch, size_in] float32.  Returns (spike_seq, new_state)."""
    T, batch, size_in = x_seq.shape
    size_out = params["w_in"].shape[1]

    num_tc, vmem_cap = _chip_info()
    bb = _pick_batch_tile(batch, num_tc)
    nb = batch // bb
    assert bb * nb == batch
    assert bb == batch or bb % 8 == 0, "batch tile must be sublane-aligned"
    tchunk = _pick_time_chunk(T, bb, size_in, size_out, vmem_cap)
    n_chunks = T // tchunk

    # Step-invariant decay factors, computed once outside the kernel.
    alpha = jnp.exp(-DT / params["tau_m"]).astype(jnp.float32)
    ro = jnp.exp(-DT / params["tau_adp"]).astype(jnp.float32)
    om_alpha = (1.0 - alpha).astype(jnp.float32)
    om_ro = (1.0 - ro).astype(jnp.float32)
    bias = (params["b_in"] + params["b_rec"]).astype(jnp.float32)

    # bf16 weights + inputs cast OUTSIDE the kernel (halves the DMA width);
    # accumulation and all LIF state math stay float32.
    x_mm = x_seq.astype(MATMUL_DTYPE)
    w_in = params["w_in"].astype(MATMUL_DTYPE)
    w_rec = params["w_rec"].astype(MATMUL_DTYPE)

    x_spec = pl.BlockSpec((tchunk, bb, size_in), lambda bi, c: (c, bi, 0))
    w_in_spec = pl.BlockSpec((size_in, size_out), lambda bi, c: (0, 0))
    w_rec_spec = pl.BlockSpec((size_out, size_out), lambda bi, c: (0, 0))
    vec_spec = pl.BlockSpec((1, size_out), lambda bi, c: (0, 0))
    st_spec = pl.BlockSpec((bb, size_out), lambda bi, c: (bi, 0))
    seq_spec = pl.BlockSpec((tchunk, bb, size_out), lambda bi, c: (c, bi, 0))
    # TODO(synk): on v7x, single-buffer the grid-invariant W/vec/state blocks
    # (pipeline_mode=pl.Buffered(1)) and stream W_rec in N-tiles when
    # size_out^2 * 2 B exceeds ~half of the 64 MiB VMEM.

    wbytes = jnp.dtype(MATMUL_DTYPE).itemsize
    footprint = (
        2 * tchunk * bb * size_in * wbytes             # x chunk (double-buffered)
        + 2 * tchunk * bb * size_out * 4               # spike_seq chunk (double-buffered)
        + 2 * (size_in + size_out) * size_out * wbytes  # W_in + W_rec (2 bufs allocated)
        + 2 * 5 * size_out * 4                         # bias + 4 decay vectors
        + 2 * 6 * bb * size_out * 4                    # init-state ins + final-state outs
        + 3 * bb * size_out * 4                        # VMEM scratch state
        + tchunk * bb * size_out * 4                   # in-kernel ff intermediate
    )
    vmem_limit = max(32 << 20, int(footprint * 1.3) + (4 << 20))
    vmem_limit = min(vmem_limit, int(vmem_cap * 0.9))

    out_shapes = (
        jax.ShapeDtypeStruct((T, batch, size_out), jnp.float32),  # spike_seq
        jax.ShapeDtypeStruct((batch, size_out), jnp.float32),     # final mem
        jax.ShapeDtypeStruct((batch, size_out), jnp.float32),     # final spike
        jax.ShapeDtypeStruct((batch, size_out), jnp.float32),     # final b
    )

    spike_seq, mem_f, spike_f, b_f = pl.pallas_call(
        _snn_scan_kernel,
        out_shape=out_shapes,
        grid_spec=pltpu.PrefetchScalarGridSpec(
            num_scalar_prefetch=0,
            grid=(nb, n_chunks),
            in_specs=[x_spec, w_in_spec, w_rec_spec, vec_spec,
                      vec_spec, vec_spec, vec_spec, vec_spec,
                      st_spec, st_spec, st_spec],
            out_specs=(seq_spec, st_spec, st_spec, st_spec),
            scratch_shapes=[pltpu.VMEM((bb, size_out), jnp.float32)] * 3,
        ),
        compiler_params=pltpu.CompilerParams(
            dimension_semantics=("parallel", "arbitrary"),
            vmem_limit_bytes=vmem_limit,
        ),
    )(x_mm, w_in, w_rec, bias,
      alpha, om_alpha, ro, om_ro,
      state["mem"], state["spike"], state["b"])

    return spike_seq, {"mem": mem_f, "spike": spike_f, "b": b_f}


def snn_layer_forward(x, params, state):
    """Single-step forward (matches SNNLayer.forward): x is [batch, size_in]."""
    spike_seq, new_state = snn_layer_forward_sequence(x[None], params, state)
    return spike_seq[0], new_state


# --- parameter / state init mirroring SNNLayer.__init__ (recurrent) ---------
def init_params(key, size_in, size_out):
    k1, k2, k3, k4 = jax.random.split(key, 4)

    def xavier_uniform(k, fan_in, fan_out, shape):
        bound = math.sqrt(6.0 / (fan_in + fan_out))
        return jax.random.uniform(k, shape, jnp.float32, -bound, bound)

    # nn.Linear weights are [out, in]; store transposed [in, out] for x @ W.
    w_in = xavier_uniform(k1, size_in, size_out, (size_out, size_in)).T
    w_rec = xavier_uniform(k2, size_out, size_out, (size_out, size_out)).T
    return {
        "w_in": jnp.asarray(w_in, jnp.float32),
        "b_in": jnp.zeros((1, size_out), jnp.float32),
        "w_rec": jnp.asarray(w_rec, jnp.float32),
        "b_rec": jnp.zeros((1, size_out), jnp.float32),
        "tau_adp": 700.0 + 25.0 * jax.random.normal(k3, (1, size_out), jnp.float32),
        "tau_m": 20.0 + 5.0 * jax.random.normal(k4, (1, size_out), jnp.float32),
    }


def init_state(batch, size_out):
    """Mirrors init_model_state: mem = spike = 0, b = b_j0 (broadcast)."""
    return {
        "mem": jnp.zeros((batch, size_out), jnp.float32),
        "spike": jnp.zeros((batch, size_out), jnp.float32),
        "b": jnp.full((batch, size_out), B_J0, jnp.float32),
    }


# --- pure-JAX reference (mem_update_adp semantics, same bf16 weights) --------
def reference_forward_sequence(x_seq, params, state):
    w_in = params["w_in"].astype(MATMUL_DTYPE)
    w_rec = params["w_rec"].astype(MATMUL_DTYPE)
    bias = params["b_in"] + params["b_rec"]
    alpha = jnp.exp(-DT / params["tau_m"])
    ro = jnp.exp(-DT / params["tau_adp"])

    def step(carry, x):
        mem, spike, b = carry
        ff = jnp.dot(x.astype(MATMUL_DTYPE), w_in,
                     preferred_element_type=jnp.float32) + bias
        rec = jnp.dot(spike.astype(MATMUL_DTYPE), w_rec,
                      preferred_element_type=jnp.float32)
        inp = ff + rec
        b_new = ro * b + (1.0 - ro) * spike
        big_b = B_J0 + BETA * b_new
        mem_new = mem * alpha + (1.0 - alpha) * R_M * inp - big_b * spike * DT
        spike_new = (mem_new - big_b > 0.0).astype(jnp.float32)
        return (mem_new, spike_new, b_new), spike_new

    (mem, spike, b), spike_seq = jax.lax.scan(
        step, (state["mem"], state["spike"], state["b"]), x_seq)
    return spike_seq, {"mem": mem, "spike": spike, "b": b}


if __name__ == "__main__":
    # Small but lane/sublane-aligned shapes: batch % 8 == 0, size_out % 128 == 0.
    T, batch, size_in, size_out = 8, 8, 64, 128
    key = jax.random.PRNGKey(0)
    kp, kx = jax.random.split(key)

    params = init_params(kp, size_in, size_out)
    state = init_state(batch, size_out)
    x_seq = jax.random.normal(kx, (T, batch, size_in), jnp.float32)

    spike_seq, new_state = snn_layer_forward_sequence(x_seq, params, state)
    jax.block_until_ready((spike_seq, new_state))

    # also exercise the single-step forward path
    spike1, state1 = snn_layer_forward(x_seq[0], params, state)
    jax.block_until_ready((spike1, state1))

    # correctness check against pure-JAX reference (same bf16 weights / f32 acc).
    # Spikes are hard thresholds, so allow a tiny flip fraction in bf16 mode.
    ref_spike_seq, ref_state = reference_forward_sequence(x_seq, params, state)
    assert spike_seq.shape == (T, batch, size_out)
    mismatch = float(jnp.mean(jnp.abs(spike_seq - ref_spike_seq)))
    assert mismatch <= 0.01, f"spike mismatch fraction too large: {mismatch}"
    if mismatch == 0.0:
        assert jnp.allclose(new_state["mem"], ref_state["mem"],
                            rtol=1e-3, atol=1e-3), "final mem mismatch"
        assert jnp.allclose(new_state["b"], ref_state["b"],
                            rtol=1e-5, atol=1e-5), "final b mismatch"
        assert jnp.array_equal(new_state["spike"], ref_state["spike"]), \
            "final spike mismatch"

    print("KERNEL_OK")
</pallas_src>

<mosaic_0001>
module attributes {stable_mosaic.version = 11 : i64} {
  func.func @_snn_scan_kernel(%arg0: i32, %arg1: i32, %arg2: memref<8x8x64xbf16, #tpu.memory_space<vmem>>, %arg3: memref<64x128xbf16, #tpu.memory_space<vmem>>, %arg4: memref<128x128xbf16, #tpu.memory_space<vmem>>, %arg5: memref<1x128xf32, #tpu.memory_space<vmem>>, %arg6: memref<1x128xf32, #tpu.memory_space<vmem>>, %arg7: memref<1x128xf32, #tpu.memory_space<vmem>>, %arg8: memref<1x128xf32, #tpu.memory_space<vmem>>, %arg9: memref<1x128xf32, #tpu.memory_space<vmem>>, %arg10: memref<8x128xf32, #tpu.memory_space<vmem>>, %arg11: memref<8x128xf32, #tpu.memory_space<vmem>>, %arg12: memref<8x128xf32, #tpu.memory_space<vmem>>, %arg13: memref<8x8x128xf32, #tpu.memory_space<vmem>>, %arg14: memref<8x128xf32, #tpu.memory_space<vmem>>, %arg15: memref<8x128xf32, #tpu.memory_space<vmem>>, %arg16: memref<8x128xf32, #tpu.memory_space<vmem>>, %arg17: memref<8x128xf32, #tpu.memory_space<vmem>>, %arg18: memref<8x128xf32, #tpu.memory_space<vmem>>, %arg19: memref<8x128xf32, #tpu.memory_space<vmem>>) attributes {dimension_semantics = [#tpu.dimension_semantics<parallel>, #tpu.dimension_semantics<arbitrary>], iteration_bounds = array<i64: 1, 1>, scalar_prefetch = 0 : i64, scratch_operands = 3 : i64, tpu.core_type = #tpu.core_type<tc>, window_params = [{transform_indices = @transform_0, window_bounds = array<i64: 8, 8, 64>}, {pipeline_mode = #tpu.pipeline_mode<synchronous>, transform_indices = @transform_1, window_bounds = array<i64: 64, 128>}, {pipeline_mode = #tpu.pipeline_mode<synchronous>, transform_indices = @transform_2, window_bounds = array<i64: 128, 128>}, {pipeline_mode = #tpu.pipeline_mode<synchronous>, transform_indices = @transform_3, window_bounds = array<i64: 1, 128>}, {pipeline_mode = #tpu.pipeline_mode<synchronous>, transform_indices = @transform_4, window_bounds = array<i64: 1, 128>}, {pipeline_mode = #tpu.pipeline_mode<synchronous>, transform_indices = @transform_5, window_bounds = array<i64: 1, 128>}, {pipeline_mode = #tpu.pipeline_mode<synchronous>, transform_indices = @transform_6, window_bounds = array<i64: 1, 128>}, {pipeline_mode = #tpu.pipeline_mode<synchronous>, transform_indices = @transform_7, window_bounds = array<i64: 1, 128>}, {transform_indices = @transform_8, window_bounds = array<i64: 8, 128>}, {transform_indices = @transform_9, window_bounds = array<i64: 8, 128>}, {transform_indices = @transform_10, window_bounds = array<i64: 8, 128>}, {transform_indices = @transform_11, window_bounds = array<i64: 8, 8, 128>}, {transform_indices = @transform_12, window_bounds = array<i64: 8, 128>}, {transform_indices = @transform_13, window_bounds = array<i64: 8, 128>}, {transform_indices = @transform_14, window_bounds = array<i64: 8, 128>}]} {
    %c0_i32 = arith.constant 0 : i32
    %0 = arith.cmpi eq, %arg1, %c0_i32 : i32
    %1 = arith.extui %0 : i1 to i32
    %c0_i32_0 = arith.constant 0 : i32
    %2 = arith.cmpi ne, %1, %c0_i32_0 : i32
    scf.if %2 {
      %c0_110 = arith.constant 0 : index
      %c0_111 = arith.constant 0 : index
      %287 = vector.load %arg10[%c0_110, %c0_111] : memref<8x128xf32, #tpu.memory_space<vmem>>, vector<8x128xf32>
      %c0_112 = arith.constant 0 : index
      %c0_113 = arith.constant 0 : index
      %288 = vector.load %arg17[%c0_112, %c0_113] : memref<8x128xf32, #tpu.memory_space<vmem>>, vector<8x128xf32>
      tpu.vector_store %arg17[%c0_112, %c0_113], %287 {strides = array<i32>} : memref<8x128xf32, #tpu.memory_space<vmem>>, vector<8x128xf32>,
      %c0_114 = arith.constant 0 : index
      %c0_115 = arith.constant 0 : index
      %289 = vector.load %arg11[%c0_114, %c0_115] : memref<8x128xf32, #tpu.memory_space<vmem>>, vector<8x128xf32>
      %c0_116 = arith.constant 0 : index
      %c0_117 = arith.constant 0 : index
      %290 = vector.load %arg18[%c0_116, %c0_117] : memref<8x128xf32, #tpu.memory_space<vmem>>, vector<8x128xf32>
      tpu.vector_store %arg18[%c0_116, %c0_117], %289 {strides = array<i32>} : memref<8x128xf32, #tpu.memory_space<vmem>>, vector<8x128xf32>,
      %c0_118 = arith.constant 0 : index
      %c0_119 = arith.constant 0 : index
      %291 = vector.load %arg12[%c0_118, %c0_119] : memref<8x128xf32, #tpu.memory_space<vmem>>, vector<8x128xf32>
      %c0_120 = arith.constant 0 : index
      %c0_121 = arith.constant 0 : index
      %292 = vector.load %arg19[%c0_120, %c0_121] : memref<8x128xf32, #tpu.memory_space<vmem>>, vector<8x128xf32>
      tpu.vector_store %arg19[%c0_120, %c0_121], %291 {strides = array<i32>} : memref<8x128xf32, #tpu.memory_space<vmem>>, vector<8x128xf32>,
    } else {
    }
    %c0 = arith.constant 0 : index
    %c0_1 = arith.constant 0 : index
    %c0_2 = arith.constant 0 : index
    %3 = vector.load %arg2[%c0, %c0_1, %c0_2] : memref<8x8x64xbf16, #tpu.memory_space<vmem>>, vector<8x8x64xbf16>
    %4 = vector.shape_cast %3 : vector<8x8x64xbf16> to vector<64x64xbf16>
    %c0_3 = arith.constant 0 : index
    %c0_4 = arith.constant 0 : index
    %5 = vector.load %arg3[%c0_3, %c0_4] : memref<64x128xbf16, #tpu.memory_space<vmem>>, vector<64x128xbf16>
    %cst = arith.constant dense<0.000000e+00> : vector<64x128xf32>
    %6 = tpu.matmul %4, %5, %cst {dimension_numbers = #tpu.dot_dimension_numbers<[1], [0], [0], [1], [0, 0, 1, 1], [], []>} : vector<64x64xbf16>, vector<64x128xbf16>, vector<64x128xf32> -> vector<64x128xf32>
    %c0_5 = arith.constant 0 : index
    %c0_6 = arith.constant 0 : index
    %7 = vector.load %arg5[%c0_5, %c0_6] : memref<1x128xf32, #tpu.memory_space<vmem>>, vector<1x128xf32>
    %8 = vector.broadcast %7 : vector<1x128xf32> to vector<64x128xf32>
    %9 = arith.addf %6, %8 : vector<64x128xf32>
    %c0_7 = arith.constant 0 : index
    %c0_8 = arith.constant 0 : index
    %10 = vector.load %arg6[%c0_7, %c0_8] : memref<1x128xf32, #tpu.memory_space<vmem>>, vector<1x128xf32>
    %c0_9 = arith.constant 0 : index
    %c0_10 = arith.constant 0 : index
    %11 = vector.load %arg7[%c0_9, %c0_10] : memref<1x128xf32, #tpu.memory_space<vmem>>, vector<1x128xf32>
    %c0_11 = arith.constant 0 : index
    %c0_12 = arith.constant 0 : index
    %12 = vector.load %arg8[%c0_11, %c0_12] : memref<1x128xf32, #tpu.memory_space<vmem>>, vector<1x128xf32>
    %c0_13 = arith.constant 0 : index
    %c0_14 = arith.constant 0 : index
    %13 = vector.load %arg9[%c0_13, %c0_14] : memref<1x128xf32, #tpu.memory_space<vmem>>, vector<1x128xf32>
    %c0_15 = arith.constant 0 : index
    %c0_16 = arith.constant 0 : index
    %14 = vector.load %arg17[%c0_15, %c0_16] : memref<8x128xf32, #tpu.memory_space<vmem>>, vector<8x128xf32>
    %c0_17 = arith.constant 0 : index
    %c0_18 = arith.constant 0 : index
    %15 = vector.load %arg18[%c0_17, %c0_18] : memref<8x128xf32, #tpu.memory_space<vmem>>, vector<8x128xf32>
    %c0_19 = arith.constant 0 : index
    %c0_20 = arith.constant 0 : index
    %16 = vector.load %arg19[%c0_19, %c0_20] : memref<8x128xf32, #tpu.memory_space<vmem>>, vector<8x128xf32>
    %17 = arith.truncf %15 : vector<8x128xf32> to vector<8x128xbf16>
    %c0_21 = arith.constant 0 : index
    %c0_22 = arith.constant 0 : index
    %18 = vector.load %arg4[%c0_21, %c0_22] : memref<128x128xbf16, #tpu.memory_space<vmem>>, vector<128x128xbf16>
    %cst_23 = arith.constant dense<0.000000e+00> : vector<8x128xf32>
    %19 = tpu.matmul %17, %18, %cst_23 {dimension_numbers = #tpu.dot_dimension_numbers<[1], [0], [0], [1], [0, 0, 1, 1], [], []>} : vector<8x128xbf16>, vector<128x128xbf16>, vector<8x128xf32> -> vector<8x128xf32>
    %20 = vector.extract_strided_slice %9 {offsets = [0, 0], sizes = [8, 128], strides = [1, 1]} : vector<64x128xf32> to vector<8x128xf32>
    %21 = arith.addf %20, %19 : vector<8x128xf32>
    %22 = vector.broadcast %12 : vector<1x128xf32> to vector<8x128xf32>
    %23 = arith.mulf %22, %16 : vector<8x128xf32>
    %24 = vector.broadcast %13 : vector<1x128xf32> to vector<8x128xf32>
    %25 = arith.mulf %24, %15 : vector<8x128xf32>
    %26 = arith.addf %23, %25 : vector<8x128xf32>
    %cst_24 = arith.constant 1.800000e+00 : f32
    %27 = vector.broadcast %cst_24 : f32 to vector<8x128xf32>
    %28 = arith.mulf %27, %26 : vector<8x128xf32>
    %cst_25 = arith.constant 0.00999999977 : f32
    %29 = vector.broadcast %cst_25 : f32 to vector<8x128xf32>
    %30 = arith.addf %29, %28 : vector<8x128xf32>
    %31 = vector.broadcast %10 : vector<1x128xf32> to vector<8x128xf32>
    %32 = arith.mulf %14, %31 : vector<8x128xf32>
    %cst_26 = arith.constant 1.000000e+00 : f32
    %33 = vector.broadcast %cst_26 : f32 to vector<1x128xf32>
    %34 = arith.mulf %11, %33 : vector<1x128xf32>
    %35 = vector.broadcast %34 : vector<1x128xf32> to vector<8x128xf32>
    %36 = arith.mulf %35, %21 : vector<8x128xf32>
    %37 = arith.addf %32, %36 : vector<8x128xf32>
    %38 = arith.mulf %30, %15 : vector<8x128xf32>
    %cst_27 = arith.constant 1.000000e+00 : f32
    %39 = vector.broadcast %cst_27 : f32 to vector<8x128xf32>
    %40 = arith.mulf %38, %39 : vector<8x128xf32>
    %41 = arith.subf %37, %40 : vector<8x128xf32>
    %42 = arith.subf %41, %30 : vector<8x128xf32>
    %cst_28 = arith.constant 0.000000e+00 : f32
    %43 = vector.broadcast %cst_28 : f32 to vector<8x128xf32>
    %44 = arith.cmpf ogt, %42, %43 : vector<8x128xf32>
    %45 = arith.extui %44 : vector<8x128xi1> to vector<8x128xi32>
    %46 = arith.sitofp %45 : vector<8x128xi32> to vector<8x128xf32>
    %c0_29 = arith.constant 0 : index
    %c0_30 = arith.constant 0 : index
    %c0_31 = arith.constant 0 : index
    %47 = vector.load %arg13[%c0_29, %c0_30, %c0_31] : memref<8x8x128xf32, #tpu.memory_space<vmem>>, vector<1x8x128xf32>
    %48 = vector.shape_cast %47 : vector<1x8x128xf32> to vector<8x128xf32>
    %49 = vector.shape_cast %46 : vector<8x128xf32> to vector<1x8x128xf32>
    tpu.vector_store %arg13[%c0_29, %c0_30, %c0_31], %49 {strides = array<i32>} : memref<8x8x128xf32, #tpu.memory_space<vmem>>, vector<1x8x128xf32>,
    %50 = arith.truncf %46 : vector<8x128xf32> to vector<8x128xbf16>
    %c0_32 = arith.constant 0 : index
    %c0_33 = arith.constant 0 : index
    %51 = vector.load %arg4[%c0_32, %c0_33] : memref<128x128xbf16, #tpu.memory_space<vmem>>, vector<128x128xbf16>
    %cst_34 = arith.constant dense<0.000000e+00> : vector<8x128xf32>
    %52 = tpu.matmul %50, %51, %cst_34 {dimension_numbers = #tpu.dot_dimension_numbers<[1], [0], [0], [1], [0, 0, 1, 1], [], []>} : vector<8x128xbf16>, vector<128x128xbf16>, vector<8x128xf32> -> vector<8x128xf32>
    %53 = vector.extract_strided_slice %9 {offsets = [8, 0], sizes = [8, 128], strides = [1, 1]} : vector<64x128xf32> to vector<8x128xf32>
    %54 = arith.addf %53, %52 : vector<8x128xf32>
    %55 = vector.broadcast %12 : vector<1x128xf32> to vector<8x128xf32>
    %56 = arith.mulf %55, %26 : vector<8x128xf32>
    %57 = vector.broadcast %13 : vector<1x128xf32> to vector<8x128xf32>
    %58 = arith.mulf %57, %46 : vector<8x128xf32>
    %59 = arith.addf %56, %58 : vector<8x128xf32>
    %cst_35 = arith.constant 1.800000e+00 : f32
    %60 = vector.broadcast %cst_35 : f32 to vector<8x128xf32>
    %61 = arith.mulf %60, %59 : vector<8x128xf32>
    %cst_36 = arith.constant 0.00999999977 : f32
    %62 = vector.broadcast %cst_36 : f32 to vector<8x128xf32>
    %63 = arith.addf %62, %61 : vector<8x128xf32>
    %64 = vector.broadcast %10 : vector<1x128xf32> to vector<8x128xf32>
    %65 = arith.mulf %41, %64 : vector<8x128xf32>
    %cst_37 = arith.constant 1.000000e+00 : f32
    %66 = vector.broadcast %cst_37 : f32 to vector<1x128xf32>
    %67 = arith.mulf %11, %66 : vector<1x128xf32>
    %68 = vector.broadcast %67 : vector<1x128xf32> to vector<8x128xf32>
    %69 = arith.mulf %68, %54 : vector<8x128xf32>
    %70 = arith.addf %65, %69 : vector<8x128xf32>
    %71 = arith.mulf %63, %46 : vector<8x128xf32>
    %cst_38 = arith.constant 1.000000e+00 : f32
    %72 = vector.broadcast %cst_38 : f32 to vector<8x128xf32>
    %73 = arith.mulf %71, %72 : vector<8x128xf32>
    %74 = arith.subf %70, %73 : vector<8x128xf32>
    %75 = arith.subf %74, %63 : vector<8x128xf32>
    %cst_39 = arith.constant 0.000000e+00 : f32
    %76 = vector.broadcast %cst_39 : f32 to vector<8x128xf32>
    %77 = arith.cmpf ogt, %75, %76 : vector<8x128xf32>
    %78 = arith.extui %77 : vector<8x128xi1> to vector<8x128xi32>
    %79 = arith.sitofp %78 : vector<8x128xi32> to vector<8x128xf32>
    %c1 = arith.constant 1 : index
    %c0_40 = arith.constant 0 : index
    %c0_41 = arith.constant 0 : index
    %80 = vector.load %arg13[%c1, %c0_40, %c0_41] : memref<8x8x128xf32, #tpu.memory_space<vmem>>, vector<1x8x128xf32>
    %81 = vector.shape_cast %80 : vector<1x8x128xf32> to vector<8x128xf32>
    %82 = vector.shape_cast %79 : vector<8x128xf32> to vector<1x8x128xf32>
    tpu.vector_store %arg13[%c1, %c0_40, %c0_41], %82 {strides = array<i32>} : memref<8x8x128xf32, #tpu.memory_space<vmem>>, vector<1x8x128xf32>,
    %83 = arith.truncf %79 : vector<8x128xf32> to vector<8x128xbf16>
    %c0_42 = arith.constant 0 : index
    %c0_43 = arith.constant 0 : index
    %84 = vector.load %arg4[%c0_42, %c0_43] : memref<128x128xbf16, #tpu.memory_space<vmem>>, vector<128x128xbf16>
    %cst_44 = arith.constant dense<0.000000e+00> : vector<8x128xf32>
    %85 = tpu.matmul %83, %84, %cst_44 {dimension_numbers = #tpu.dot_dimension_numbers<[1], [0], [0], [1], [0, 0, 1, 1], [], []>} : vector<8x128xbf16>, vector<128x128xbf16>, vector<8x128xf32> -> vector<8x128xf32>
    %86 = vector.extract_strided_slice %9 {offsets = [16, 0], sizes = [8, 128], strides = [1, 1]} : vector<64x128xf32> to vector<8x128xf32>
    %87 = arith.addf %86, %85 : vector<8x128xf32>
    %88 = vector.broadcast %12 : vector<1x128xf32> to vector<8x128xf32>
    %89 = arith.mulf %88, %59 : vector<8x128xf32>
    %90 = vector.broadcast %13 : vector<1x128xf32> to vector<8x128xf32>
    %91 = arith.mulf %90, %79 : vector<8x128xf32>
    %92 = arith.addf %89, %91 : vector<8x128xf32>
    %cst_45 = arith.constant 1.800000e+00 : f32
    %93 = vector.broadcast %cst_45 : f32 to vector<8x128xf32>
    %94 = arith.mulf %93, %92 : vector<8x128xf32>
    %cst_46 = arith.constant 0.00999999977 : f32
    %95 = vector.broadcast %cst_46 : f32 to vector<8x128xf32>
    %96 = arith.addf %95, %94 : vector<8x128xf32>
    %97 = vector.broadcast %10 : vector<1x128xf32> to vector<8x128xf32>
    %98 = arith.mulf %74, %97 : vector<8x128xf32>
    %cst_47 = arith.constant 1.000000e+00 : f32
    %99 = vector.broadcast %cst_47 : f32 to vector<1x128xf32>
    %100 = arith.mulf %11, %99 : vector<1x128xf32>
    %101 = vector.broadcast %100 : vector<1x128xf32> to vector<8x128xf32>
    %102 = arith.mulf %101, %87 : vector<8x128xf32>
    %103 = arith.addf %98, %102 : vector<8x128xf32>
    %104 = arith.mulf %96, %79 : vector<8x128xf32>
    %cst_48 = arith.constant 1.000000e+00 : f32
    %105 = vector.broadcast %cst_48 : f32 to vector<8x128xf32>
    %106 = arith.mulf %104, %105 : vector<8x128xf32>
    %107 = arith.subf %103, %106 : vector<8x128xf32>
    %108 = arith.subf %107, %96 : vector<8x128xf32>
    %cst_49 = arith.constant 0.000000e+00 : f32
    %109 = vector.broadcast %cst_49 : f32 to vector<8x128xf32>
    %110 = arith.cmpf ogt, %108, %109 : vector<8x128xf32>
    %111 = arith.extui %110 : vector<8x128xi1> to vector<8x128xi32>
    %112 = arith.sitofp %111 : vector<8x128xi32> to vector<8x128xf32>
    %c2 = arith.constant 2 : index
    %c0_50 = arith.constant 0 : index
    %c0_51 = arith.constant 0 : index
    %113 = vector.load %arg13[%c2, %c0_50, %c0_51] : memref<8x8x128xf32, #tpu.memory_space<vmem>>, vector<1x8x128xf32>
    %114 = vector.shape_cast %113 : vector<1x8x128xf32> to vector<8x128xf32>
    %115 = vector.shape_cast %112 : vector<8x128xf32> to vector<1x8x128xf32>
    tpu.vector_store %arg13[%c2, %c0_50, %c0_51], %115 {strides = array<i32>} : memref<8x8x128xf32, #tpu.memory_space<vmem>>, vector<1x8x128xf32>,
    %116 = arith.truncf %112 : vector<8x128xf32> to vector<8x128xbf16>
    %c0_52 = arith.constant 0 : index
    %c0_53 = arith.constant 0 : index
    %117 = vector.load %arg4[%c0_52, %c0_53] : memref<128x128xbf16, #tpu.memory_space<vmem>>, vector<128x128xbf16>
    %cst_54 = arith.constant dense<0.000000e+00> : vector<8x128xf32>
    %118 = tpu.matmul %116, %117, %cst_54 {dimension_numbers = #tpu.dot_dimension_numbers<[1], [0], [0], [1], [0, 0, 1, 1], [], []>} : vector<8x128xbf16>, vector<128x128xbf16>, vector<8x128xf32> -> vector<8x128xf32>
    %119 = vector.extract_strided_slice %9 {offsets = [24, 0], sizes = [8, 128], strides = [1, 1]} : vector<64x128xf32> to vector<8x128xf32>
    %120 = arith.addf %119, %118 : vector<8x128xf32>
    %121 = vector.broadcast %12 : vector<1x128xf32> to vector<8x128xf32>
    %122 = arith.mulf %121, %92 : vector<8x128xf32>
    %123 = vector.broadcast %13 : vector<1x128xf32> to vector<8x128xf32>
    %124 = arith.mulf %123, %112 : vector<8x128xf32>
    %125 = arith.addf %122, %124 : vector<8x128xf32>
    %cst_55 = arith.constant 1.800000e+00 : f32
    %126 = vector.broadcast %cst_55 : f32 to vector<8x128xf32>
    %127 = arith.mulf %126, %125 : vector<8x128xf32>
    %cst_56 = arith.constant 0.00999999977 : f32
    %128 = vector.broadcast %cst_56 : f32 to vector<8x128xf32>
    %129 = arith.addf %128, %127 : vector<8x128xf32>
    %130 = vector.broadcast %10 : vector<1x128xf32> to vector<8x128xf32>
    %131 = arith.mulf %107, %130 : vector<8x128xf32>
    %cst_57 = arith.constant 1.000000e+00 : f32
    %132 = vector.broadcast %cst_57 : f32 to vector<1x128xf32>
    %133 = arith.mulf %11, %132 : vector<1x128xf32>
    %134 = vector.broadcast %133 : vector<1x128xf32> to vector<8x128xf32>
    %135 = arith.mulf %134, %120 : vector<8x128xf32>
    %136 = arith.addf %131, %135 : vector<8x128xf32>
    %137 = arith.mulf %129, %112 : vector<8x128xf32>
    %cst_58 = arith.constant 1.000000e+00 : f32
    %138 = vector.broadcast %cst_58 : f32 to vector<8x128xf32>
    %139 = arith.mulf %137, %138 : vector<8x128xf32>
    %140 = arith.subf %136, %139 : vector<8x128xf32>
    %141 = arith.subf %140, %129 : vector<8x128xf32>
    %cst_59 = arith.constant 0.000000e+00 : f32
    %142 = vector.broadcast %cst_59 : f32 to vector<8x128xf32>
    %143 = arith.cmpf ogt, %141, %142 : vector<8x128xf32>
    %144 = arith.extui %143 : vector<8x128xi1> to vector<8x128xi32>
    %145 = arith.sitofp %144 : vector<8x128xi32> to vector<8x128xf32>
    %c3 = arith.constant 3 : index
    %c0_60 = arith.constant 0 : index
    %c0_61 = arith.constant 0 : index
    %146 = vector.load %arg13[%c3, %c0_60, %c0_61] : memref<8x8x128xf32, #tpu.memory_space<vmem>>, vector<1x8x128xf32>
    %147 = vector.shape_cast %146 : vector<1x8x128xf32> to vector<8x128xf32>
    %148 = vector.shape_cast %145 : vector<8x128xf32> to vector<1x8x128xf32>
    tpu.vector_store %arg13[%c3, %c0_60, %c0_61], %148 {strides = array<i32>} : memref<8x8x128xf32, #tpu.memory_space<vmem>>, vector<1x8x128xf32>,
    %149 = arith.truncf %145 : vector<8x128xf32> to vector<8x128xbf16>
    %c0_62 = arith.constant 0 : index
    %c0_63 = arith.constant 0 : index
    %150 = vector.load %arg4[%c0_62, %c0_63] : memref<128x128xbf16, #tpu.memory_space<vmem>>, vector<128x128xbf16>
    %cst_64 = arith.constant dense<0.000000e+00> : vector<8x128xf32>
    %151 = tpu.matmul %149, %150, %cst_64 {dimension_numbers = #tpu.dot_dimension_numbers<[1], [0], [0], [1], [0, 0, 1, 1], [], []>} : vector<8x128xbf16>, vector<128x128xbf16>, vector<8x128xf32> -> vector<8x128xf32>
    %152 = vector.extract_strided_slice %9 {offsets = [32, 0], sizes = [8, 128], strides = [1, 1]} : vector<64x128xf32> to vector<8x128xf32>
    %153 = arith.addf %152, %151 : vector<8x128xf32>
    %154 = vector.broadcast %12 : vector<1x128xf32> to vector<8x128xf32>
    %155 = arith.mulf %154, %125 : vector<8x128xf32>
    %156 = vector.broadcast %13 : vector<1x128xf32> to vector<8x128xf32>
    %157 = arith.mulf %156, %145 : vector<8x128xf32>
    %158 = arith.addf %155, %157 : vector<8x128xf32>
    %cst_65 = arith.constant 1.800000e+00 : f32
    %159 = vector.broadcast %cst_65 : f32 to vector<8x128xf32>
    %160 = arith.mulf %159, %158 : vector<8x128xf32>
    %cst_66 = arith.constant 0.00999999977 : f32
    %161 = vector.broadcast %cst_66 : f32 to vector<8x128xf32>
    %162 = arith.addf %161, %160 : vector<8x128xf32>
    %163 = vector.broadcast %10 : vector<1x128xf32> to vector<8x128xf32>
    %164 = arith.mulf %140, %163 : vector<8x128xf32>
    %cst_67 = arith.constant 1.000000e+00 : f32
    %165 = vector.broadcast %cst_67 : f32 to vector<1x128xf32>
    %166 = arith.mulf %11, %165 : vector<1x128xf32>
    %167 = vector.broadcast %166 : vector<1x128xf32> to vector<8x128xf32>
    %168 = arith.mulf %167, %153 : vector<8x128xf32>
    %169 = arith.addf %164, %168 : vector<8x128xf32>
    %170 = arith.mulf %162, %145 : vector<8x128xf32>
    %cst_68 = arith.constant 1.000000e+00 : f32
    %171 = vector.broadcast %cst_68 : f32 to vector<8x128xf32>
    %172 = arith.mulf %170, %171 : vector<8x128xf32>
    %173 = arith.subf %169, %172 : vector<8x128xf32>
    %174 = arith.subf %173, %162 : vector<8x128xf32>
    %cst_69 = arith.constant 0.000000e+00 : f32
    %175 = vector.broadcast %cst_69 : f32 to vector<8x128xf32>
    %176 = arith.cmpf ogt, %174, %175 : vector<8x128xf32>
    %177 = arith.extui %176 : vector<8x128xi1> to vector<8x128xi32>
    %178 = arith.sitofp %177 : vector<8x128xi32> to vector<8x128xf32>
    %c4 = arith.constant 4 : index
    %c0_70 = arith.constant 0 : index
    %c0_71 = arith.constant 0 : index
    %179 = vector.load %arg13[%c4, %c0_70, %c0_71] : memref<8x8x128xf32, #tpu.memory_space<vmem>>, vector<1x8x128xf32>
    %180 = vector.shape_cast %179 : vector<1x8x128xf32> to vector<8x128xf32>
    %181 = vector.shape_cast %178 : vector<8x128xf32> to vector<1x8x128xf32>
    tpu.vector_store %arg13[%c4, %c0_70, %c0_71], %181 {strides = array<i32>} : memref<8x8x128xf32, #tpu.memory_space<vmem>>, vector<1x8x128xf32>,
    %182 = arith.truncf %178 : vector<8x128xf32> to vector<8x128xbf16>
    %c0_72 = arith.constant 0 : index
    %c0_73 = arith.constant 0 : index
    %183 = vector.load %arg4[%c0_72, %c0_73] : memref<128x128xbf16, #tpu.memory_space<vmem>>, vector<128x128xbf16>
    %cst_74 = arith.constant dense<0.000000e+00> : vector<8x128xf32>
    %184 = tpu.matmul %182, %183, %cst_74 {dimension_numbers = #tpu.dot_dimension_numbers<[1], [0], [0], [1], [0, 0, 1, 1], [], []>} : vector<8x128xbf16>, vector<128x128xbf16>, vector<8x128xf32> -> vector<8x128xf32>
    %185 = vector.extract_strided_slice %9 {offsets = [40, 0], sizes = [8, 128], strides = [1, 1]} : vector<64x128xf32> to vector<8x128xf32>
    %186 = arith.addf %185, %184 : vector<8x128xf32>
    %187 = vector.broadcast %12 : vector<1x128xf32> to vector<8x128xf32>
    %188 = arith.mulf %187, %158 : vector<8x128xf32>
    %189 = vector.broadcast %13 : vector<1x128xf32> to vector<8x128xf32>
    %190 = arith.mulf %189, %178 : vector<8x128xf32>
    %191 = arith.addf %188, %190 : vector<8x128xf32>
    %cst_75 = arith.constant 1.800000e+00 : f32
    %192 = vector.broadcast %cst_75 : f32 to vector<8x128xf32>
    %193 = arith.mulf %192, %191 : vector<8x128xf32>
    %cst_76 = arith.constant 0.00999999977 : f32
    %194 = vector.broadcast %cst_76 : f32 to vector<8x128xf32>
    %195 = arith.addf %194, %193 : vector<8x128xf32>
    %196 = vector.broadcast %10 : vector<1x128xf32> to vector<8x128xf32>
    %197 = arith.mulf %173, %196 : vector<8x128xf32>
    %cst_77 = arith.constant 1.000000e+00 : f32
    %198 = vector.broadcast %cst_77 : f32 to vector<1x128xf32>
    %199 = arith.mulf %11, %198 : vector<1x128xf32>
    %200 = vector.broadcast %199 : vector<1x128xf32> to vector<8x128xf32>
    %201 = arith.mulf %200, %186 : vector<8x128xf32>
    %202 = arith.addf %197, %201 : vector<8x128xf32>
    %203 = arith.mulf %195, %178 : vector<8x128xf32>
    %cst_78 = arith.constant 1.000000e+00 : f32
    %204 = vector.broadcast %cst_78 : f32 to vector<8x128xf32>
    %205 = arith.mulf %203, %204 : vector<8x128xf32>
    %206 = arith.subf %202, %205 : vector<8x128xf32>
    %207 = arith.subf %206, %195 : vector<8x128xf32>
    %cst_79 = arith.constant 0.000000e+00 : f32
    %208 = vector.broadcast %cst_79 : f32 to vector<8x128xf32>
    %209 = arith.cmpf ogt, %207, %208 : vector<8x128xf32>
    %210 = arith.extui %209 : vector<8x128xi1> to vector<8x128xi32>
    %211 = arith.sitofp %210 : vector<8x128xi32> to vector<8x128xf32>
    %c5 = arith.constant 5 : index
    %c0_80 = arith.constant 0 : index
    %c0_81 = arith.constant 0 : index
    %212 = vector.load %arg13[%c5, %c0_80, %c0_81] : memref<8x8x128xf32, #tpu.memory_space<vmem>>, vector<1x8x128xf32>
    %213 = vector.shape_cast %212 : vector<1x8x128xf32> to vector<8x128xf32>
    %214 = vector.shape_cast %211 : vector<8x128xf32> to vector<1x8x128xf32>
    tpu.vector_store %arg13[%c5, %c0_80, %c0_81], %214 {strides = array<i32>} : memref<8x8x128xf32, #tpu.memory_space<vmem>>, vector<1x8x128xf32>,
    %215 = arith.truncf %211 : vector<8x128xf32> to vector<8x128xbf16>
    %c0_82 = arith.constant 0 : index
    %c0_83 = arith.constant 0 : index
    %216 = vector.load %arg4[%c0_82, %c0_83] : memref<128x128xbf16, #tpu.memory_space<vmem>>, vector<128x128xbf16>
    %cst_84 = arith.constant dense<0.000000e+00> : vector<8x128xf32>
    %217 = tpu.matmul %215, %216, %cst_84 {dimension_numbers = #tpu.dot_dimension_numbers<[1], [0], [0], [1], [0, 0, 1, 1], [], []>} : vector<8x128xbf16>, vector<128x128xbf16>, vector<8x128xf32> -> vector<8x128xf32>
    %218 = vector.extract_strided_slice %9 {offsets = [48, 0], sizes = [8, 128], strides = [1, 1]} : vector<64x128xf32> to vector<8x128xf32>
    %219 = arith.addf %218, %217 : vector<8x128xf32>
    %220 = vector.broadcast %12 : vector<1x128xf32> to vector<8x128xf32>
    %221 = arith.mulf %220, %191 : vector<8x128xf32>
    %222 = vector.broadcast %13 : vector<1x128xf32> to vector<8x128xf32>
    %223 = arith.mulf %222, %211 : vector<8x128xf32>
    %224 = arith.addf %221, %223 : vector<8x128xf32>
    %cst_85 = arith.constant 1.800000e+00 : f32
    %225 = vector.broadcast %cst_85 : f32 to vector<8x128xf32>
    %226 = arith.mulf %225, %224 : vector<8x128xf32>
    %cst_86 = arith.constant 0.00999999977 : f32
    %227 = vector.broadcast %cst_86 : f32 to vector<8x128xf32>
    %228 = arith.addf %227, %226 : vector<8x128xf32>
    %229 = vector.broadcast %10 : vector<1x128xf32> to vector<8x128xf32>
    %230 = arith.mulf %206, %229 : vector<8x128xf32>
    %cst_87 = arith.constant 1.000000e+00 : f32
    %231 = vector.broadcast %cst_87 : f32 to vector<1x128xf32>
    %232 = arith.mulf %11, %231 : vector<1x128xf32>
    %233 = vector.broadcast %232 : vector<1x128xf32> to vector<8x128xf32>
    %234 = arith.mulf %233, %219 : vector<8x128xf32>
    %235 = arith.addf %230, %234 : vector<8x128xf32>
    %236 = arith.mulf %228, %211 : vector<8x128xf32>
    %cst_88 = arith.constant 1.000000e+00 : f32
    %237 = vector.broadcast %cst_88 : f32 to vector<8x128xf32>
    %238 = arith.mulf %236, %237 : vector<8x128xf32>
    %239 = arith.subf %235, %238 : vector<8x128xf32>
    %240 = arith.subf %239, %228 : vector<8x128xf32>
    %cst_89 = arith.constant 0.000000e+00 : f32
    %241 = vector.broadcast %cst_89 : f32 to vector<8x128xf32>
    %242 = arith.cmpf ogt, %240, %241 : vector<8x128xf32>
    %243 = arith.extui %242 : vector<8x128xi1> to vector<8x128xi32>
    %244 = arith.sitofp %243 : vector<8x128xi32> to vector<8x128xf32>
    %c6 = arith.constant 6 : index
    %c0_90 = arith.constant 0 : index
    %c0_91 = arith.constant 0 : index
    %245 = vector.load %arg13[%c6, %c0_90, %c0_91] : memref<8x8x128xf32, #tpu.memory_space<vmem>>, vector<1x8x128xf32>
    %246 = vector.shape_cast %245 : vector<1x8x128xf32> to vector<8x128xf32>
    %247 = vector.shape_cast %244 : vector<8x128xf32> to vector<1x8x128xf32>
    tpu.vector_store %arg13[%c6, %c0_90, %c0_91], %247 {strides = array<i32>} : memref<8x8x128xf32, #tpu.memory_space<vmem>>, vector<1x8x128xf32>,
    %248 = arith.truncf %244 : vector<8x128xf32> to vector<8x128xbf16>
    %c0_92 = arith.constant 0 : index
    %c0_93 = arith.constant 0 : index
    %249 = vector.load %arg4[%c0_92, %c0_93] : memref<128x128xbf16, #tpu.memory_space<vmem>>, vector<128x128xbf16>
    %cst_94 = arith.constant dense<0.000000e+00> : vector<8x128xf32>
    %250 = tpu.matmul %248, %249, %cst_94 {dimension_numbers = #tpu.dot_dimension_numbers<[1], [0], [0], [1], [0, 0, 1, 1], [], []>} : vector<8x128xbf16>, vector<128x128xbf16>, vector<8x128xf32> -> vector<8x128xf32>
    %251 = vector.extract_strided_slice %9 {offsets = [56, 0], sizes = [8, 128], strides = [1, 1]} : vector<64x128xf32> to vector<8x128xf32>
    %252 = arith.addf %251, %250 : vector<8x128xf32>
    %253 = vector.broadcast %12 : vector<1x128xf32> to vector<8x128xf32>
    %254 = arith.mulf %253, %224 : vector<8x128xf32>
    %255 = vector.broadcast %13 : vector<1x128xf32> to vector<8x128xf32>
    %256 = arith.mulf %255, %244 : vector<8x128xf32>
    %257 = arith.addf %254, %256 : vector<8x128xf32>
    %cst_95 = arith.constant 1.800000e+00 : f32
    %258 = vector.broadcast %cst_95 : f32 to vector<8x128xf32>
    %259 = arith.mulf %258, %257 : vector<8x128xf32>
    %cst_96 = arith.constant 0.00999999977 : f32
    %260 = vector.broadcast %cst_96 : f32 to vector<8x128xf32>
    %261 = arith.addf %260, %259 : vector<8x128xf32>
    %262 = vector.broadcast %10 : vector<1x128xf32> to vector<8x128xf32>
    %263 = arith.mulf %239, %262 : vector<8x128xf32>
    %cst_97 = arith.constant 1.000000e+00 : f32
    %264 = vector.broadcast %cst_97 : f32 to vector<1x128xf32>
    %265 = arith.mulf %11, %264 : vector<1x128xf32>
    %266 = vector.broadcast %265 : vector<1x128xf32> to vector<8x128xf32>
    %267 = arith.mulf %266, %252 : vector<8x128xf32>
    %268 = arith.addf %263, %267 : vector<8x128xf32>
    %269 = arith.mulf %261, %244 : vector<8x128xf32>
    %cst_98 = arith.constant 1.000000e+00 : f32
    %270 = vector.broadcast %cst_98 : f32 to vector<8x128xf32>
    %271 = arith.mulf %269, %270 : vector<8x128xf32>
    %272 = arith.subf %268, %271 : vector<8x128xf32>
    %273 = arith.subf %272, %261 : vector<8x128xf32>
    %cst_99 = arith.constant 0.000000e+00 : f32
    %274 = vector.broadcast %cst_99 : f32 to vector<8x128xf32>
    %275 = arith.cmpf ogt, %273, %274 : vector<8x128xf32>
    %276 = arith.extui %275 : vector<8x128xi1> to vector<8x128xi32>
    %277 = arith.sitofp %276 : vector<8x128xi32> to vector<8x128xf32>
    %c7 = arith.constant 7 : index
    %c0_100 = arith.constant 0 : index
    %c0_101 = arith.constant 0 : index
    %278 = vector.load %arg13[%c7, %c0_100, %c0_101] : memref<8x8x128xf32, #tpu.memory_space<vmem>>, vector<1x8x128xf32>
    %279 = vector.shape_cast %278 : vector<1x8x128xf32> to vector<8x128xf32>
    %280 = vector.shape_cast %277 : vector<8x128xf32> to vector<1x8x128xf32>
    tpu.vector_store %arg13[%c7, %c0_100, %c0_101], %280 {strides = array<i32>} : memref<8x8x128xf32, #tpu.memory_space<vmem>>, vector<1x8x128xf32>,
    %c0_102 = arith.constant 0 : index
    %c0_103 = arith.constant 0 : index
    %281 = vector.load %arg17[%c0_102, %c0_103] : memref<8x128xf32, #tpu.memory_space<vmem>>, vector<8x128xf32>
    tpu.vector_store %arg17[%c0_102, %c0_103], %272 {strides = array<i32>} : memref<8x128xf32, #tpu.memory_space<vmem>>, vector<8x128xf32>,
    %c0_104 = arith.constant 0 : index
    %c0_105 = arith.constant 0 : index
    %282 = vector.load %arg18[%c0_104, %c0_105] : memref<8x128xf32, #tpu.memory_space<vmem>>, vector<8x128xf32>
    tpu.vector_store %arg18[%c0_104, %c0_105], %277 {strides = array<i32>} : memref<8x128xf32, #tpu.memory_space<vmem>>, vector<8x128xf32>,
    %c0_106 = arith.constant 0 : index
    %c0_107 = arith.constant 0 : index
    %283 = vector.load %arg19[%c0_106, %c0_107] : memref<8x128xf32, #tpu.memory_space<vmem>>, vector<8x128xf32>
    tpu.vector_store %arg19[%c0_106, %c0_107], %257 {strides = array<i32>} : memref<8x128xf32, #tpu.memory_space<vmem>>, vector<8x128xf32>,
    %c0_i32_108 = arith.constant 0 : i32
    %284 = arith.cmpi eq, %arg1, %c0_i32_108 : i32
    %285 = arith.extui %284 : i1 to i32
    %c0_i32_109 = arith.constant 0 : i32
    %286 = arith.cmpi ne, %285, %c0_i32_109 : i32
    scf.if %286 {
      %c0_110 = arith.constant 0 : index
      %c0_111 = arith.constant 0 : index
      %287 = vector.load %arg14[%c0_110, %c0_111] : memref<8x128xf32, #tpu.memory_space<vmem>>, vector<8x128xf32>
      tpu.vector_store %arg14[%c0_110, %c0_111], %272 {strides = array<i32>} : memref<8x128xf32, #tpu.memory_space<vmem>>, vector<8x128xf32>,
      %c0_112 = arith.constant 0 : index
      %c0_113 = arith.constant 0 : index
      %288 = vector.load %arg15[%c0_112, %c0_113] : memref<8x128xf32, #tpu.memory_space<vmem>>, vector<8x128xf32>
      tpu.vector_store %arg15[%c0_112, %c0_113], %277 {strides = array<i32>} : memref<8x128xf32, #tpu.memory_space<vmem>>, vector<8x128xf32>,
      %c0_114 = arith.constant 0 : index
      %c0_115 = arith.constant 0 : index
      %289 = vector.load %arg16[%c0_114, %c0_115] : memref<8x128xf32, #tpu.memory_space<vmem>>, vector<8x128xf32>
      tpu.vector_store %arg16[%c0_114, %c0_115], %257 {strides = array<i32>} : memref<8x128xf32, #tpu.memory_space<vmem>>, vector<8x128xf32>,
    } else {
    }
    return
  }
  func.func @transform_0(%arg0: i32, %arg1: i32) -> (i32, i32, i32) {
    %c0_i32 = arith.constant 0 : i32
    %c0_i32_0 = arith.constant 0 : i32
    return %arg1, %arg0, %c0_i32 : i32, i32, i32
  }
  func.func @transform_1(%arg0: i32, %arg1: i32) -> (i32, i32) {
    %c0_i32 = arith.constant 0 : i32
    %c0_i32_0 = arith.constant 0 : i32
    %c0_i32_1 = arith.constant 0 : i32
    return %c0_i32, %c0_i32_0 : i32, i32
  }
  func.func @transform_2(%arg0: i32, %arg1: i32) -> (i32, i32) {
    %c0_i32 = arith.constant 0 : i32
    %c0_i32_0 = arith.constant 0 : i32
    %c0_i32_1 = arith.constant 0 : i32
    return %c0_i32, %c0_i32_0 : i32, i32
  }
  func.func @transform_3(%arg0: i32, %arg1: i32) -> (i32, i32) {
    %c0_i32 = arith.constant 0 : i32
    %c0_i32_0 = arith.constant 0 : i32
    %c0_i32_1 = arith.constant 0 : i32
    return %c0_i32, %c0_i32_0 : i32, i32
  }
  func.func @transform_4(%arg0: i32, %arg1: i32) -> (i32, i32) {
    %c0_i32 = arith.constant 0 : i32
    %c0_i32_0 = arith.constant 0 : i32
    %c0_i32_1 = arith.constant 0 : i32
    return %c0_i32, %c0_i32_0 : i32, i32
  }
  func.func @transform_5(%arg0: i32, %arg1: i32) -> (i32, i32) {
    %c0_i32 = arith.constant 0 : i32
    %c0_i32_0 = arith.constant 0 : i32
    %c0_i32_1 = arith.constant 0 : i32
    return %c0_i32, %c0_i32_0 : i32, i32
  }
  func.func @transform_6(%arg0: i32, %arg1: i32) -> (i32, i32) {
    %c0_i32 = arith.constant 0 : i32
    %c0_i32_0 = arith.constant 0 : i32
    %c0_i32_1 = arith.constant 0 : i32
    return %c0_i32, %c0_i32_0 : i32, i32
  }
  func.func @transform_7(%arg0: i32, %arg1: i32) -> (i32, i32) {
    %c0_i32 = arith.constant 0 : i32
    %c0_i32_0 = arith.constant 0 : i32
    %c0_i32_1 = arith.constant 0 : i32
    return %c0_i32, %c0_i32_0 : i32, i32
  }
  func.func @transform_8(%arg0: i32, %arg1: i32) -> (i32, i32) {
    %c0_i32 = arith.constant 0 : i32
    %c0_i32_0 = arith.constant 0 : i32
    return %arg0, %c0_i32 : i32, i32
  }
  func.func @transform_9(%arg0: i32, %arg1: i32) -> (i32, i32) {
    %c0_i32 = arith.constant 0 : i32
    %c0_i32_0 = arith.constant 0 : i32
    return %arg0, %c0_i32 : i32, i32
  }
  func.func @transform_10(%arg0: i32, %arg1: i32) -> (i32, i32) {
    %c0_i32 = arith.constant 0 : i32
    %c0_i32_0 = arith.constant 0 : i32
    return %arg0, %c0_i32 : i32, i32
  }
  func.func @transform_11(%arg0: i32, %arg1: i32) -> (i32, i32, i32) {
    %c0_i32 = arith.constant 0 : i32
    %c0_i32_0 = arith.constant 0 : i32
    return %arg1, %arg0, %c0_i32 : i32, i32, i32
  }
  func.func @transform_12(%arg0: i32, %arg1: i32) -> (i32, i32) {
    %c0_i32 = arith.constant 0 : i32
    %c0_i32_0 = arith.constant 0 : i32
    return %arg0, %c0_i32 : i32, i32
  }
  func.func @transform_13(%arg0: i32, %arg1: i32) -> (i32, i32) {
    %c0_i32 = arith.constant 0 : i32
    %c0_i32_0 = arith.constant 0 : i32
    return %arg0, %c0_i32 : i32, i32
  }
  func.func @transform_14(%arg0: i32, %arg1: i32) -> (i32, i32) {
    %c0_i32 = arith.constant 0 : i32
    %c0_i32_0 = arith.constant 0 : i32
    return %arg0, %c0_i32 : i32, i32
  }
}

</mosaic_0001>

<bundles_post_ra>
// kernel: tpu_custom_call.1
= control target key start
LH: loop header
LB: loop body
LE: loop exit
PB: predicated region body
PF: predicated region fallthrough
CT: control target
= control target key end

     0   :  { %20 = vsyncpa [#allocation6], 0  ;;  %s2473_s0 = inlined_call_operand.hbm [shape: bf16[8,8,64], index: 0, kind: input, shape index: {}]   ;;  %s2474_s1 = inlined_call_operand.hbm [shape: bf16[64,128], index: 1, kind: input, shape index: {}]   ;;  %s2475_s2 = inlined_call_operand.hbm [shape: bf16[128,128], index: 2, kind: input, shape index: {}]   ;;  %s2476_s3 = inlined_call_operand.vmem [shape: f32[1,128], index: 3, kind: input, shape index: {}]   ;;  %s2477_s4 = inlined_call_operand.vmem [shape: f32[1,128], index: 4, kind: input, shape index: {}]   ;;  %s2478_s5 = inlined_call_operand.hbm [shape: f32[1,128], index: 5, kind: input, shape index: {}]   ;;  %s2479_s6 = inlined_call_operand.hbm [shape: f32[1,128], index: 6, kind: input, shape index: {}]   ;;  %s2480_s7 = inlined_call_operand.hbm [shape: f32[1,128], index: 7, kind: input, shape index: {}]   ;;  %s2481_s8 = inlined_call_operand.vmem [shape: f32[8,128], index: 8, kind: input, shape index: {}]   ;;  %s2482_s9 = inlined_call_operand.vmem [shape: f32[8,128], index: 9, kind: input, shape index: {}]   ;;  %s2483_s10 = inlined_call_operand.vmem [shape: f32[8,128], index: 10, kind: input, shape index: {}]   ;;  %s2484_s11 = inlined_call_operand.hbm [shape: f32[8,8,128], index: 11, kind: output, shape index: {0}]   ;;  %s2485_s12 = inlined_call_operand.hbm [shape: f32[8,128], index: 12, kind: output, shape index: {1}]   ;;  %s2486_s13 = inlined_call_operand.hbm [shape: f32[8,128], index: 13, kind: output, shape index: {2}]   ;;  %s2487_s14 = inlined_call_operand.hbm [shape: f32[8,128], index: 14, kind: output, shape index: {3}]  }
   0x1   :  { %21 = vsyncpa [#allocation9], 0 }
   0x2   :  { %22 = vsyncpa [#allocation12], 0 }
   0x3   :  { %23 = vsyncpa [#allocation15], 0 }
   0x4   :  { %24 = vsyncpa [#allocation7], 0 }
   0x5   :  { %25 = vsyncpa [#allocation18], 0 }
   0x6   :  { %26 = vsyncpa [#allocation21], 0  ;;  %s2035_s29 = smov [#allocation8]   ;;  %s2036_s15 = smov [#allocation11]  }
   0x7   :  { %s44_s30 = sshll.u32 %s2035_s29, 4  ;;  %s73_s16 = sshll.u32 %s2036_s15, 4  ;;  %s45_s30 = int_to_ptr.vmem [resolvable:$true] %s44_s30  ;;  %s2127_s16 = int_to_ptr.vmem [resolvable:$true] %s73_s16 }
   0x8   :  { %s1801_s19 = scalar_lea.hbm %s2474_s1, 512 }
   0x9   :  { %p1802_p0 = scmp.ne.s32.totalorder %s2474_s1, %s1801_s19  ;;  %p1805_p1 = scmp.lt.u32.totalorder %s1801_s19, %s2474_s1 }
   0xb   :  { %p1807_p2 = pnand %p1805_p1, %p1802_p0 }
   0xd   :  { %1810 = shalt.err (!%p1807_p2)
}
   0xe   :  { %s1811_s24 = scalar_lea.vmem %s45_s30, 512  ;;  %p1816_p4 = scmp.lt.s32.totalorder %s45_s30, %s45_s30 }
   0xf   :  { %p1812_p3 = scmp.ne.s32.totalorder %s45_s30, %s1811_s24  ;;  %p1817_p5 = scmp.lt.s32.totalorder %s1811_s24, %s1811_s24 }
  0x11   :  { %p1818_p6 = por %p1817_p5, %p1816_p4 }
  0x13   :  { %p1819_p7 = pnand %p1818_p6, %p1812_p3 }
  0x15   :  { %1822 = shalt.err (!%p1819_p7)
}
  0x16   :  { %s2037_s25 = smov 64   ;;  %s2038_s26 = smov 4  }
  0x17   :  { %50 = dma.hbm_to_vmem [thread:$0]  %s2474_s1, 512, %s45_s30, [#allocation9], %s2037_s25, %s2037_s25, %s2038_s26  }
  0x18   :  { %s1823_s17 = scalar_lea.hbm %s2478_s5, 16 }
  0x19   :  { %p1824_p8 = scmp.ne.s32.totalorder %s2478_s5, %s1823_s17  ;;  %p1827_p9 = scmp.lt.u32.totalorder %s1823_s17, %s2478_s5 }
  0x1b   :  { %p1829_p10 = pnand %p1827_p9, %p1824_p8 }
  0x1d   :  { %1832 = shalt.err (!%p1829_p10)
}
  0x1e   :  { %s1833_s22 = scalar_lea.vmem %s2127_s16, 16  ;;  %s1837_s1 = scalar_lea.vmem %s2127_s16, 32 }
  0x1f   :  { %p1834_p11 = scmp.ne.s32.totalorder %s2127_s16, %s1833_s22  ;;  %p1838_p12 = scmp.lt.s32.totalorder %s2127_s16, %s2127_s16 }
  0x20   :  { %p1839_p13 = scmp.lt.s32.totalorder %s1837_s1, %s1833_s22 }
  0x22   :  { %p1840_p0 = por %p1839_p13, %p1838_p12 }
  0x24   :  { %p1841_p1 = pnand %p1840_p0, %p1834_p11 }
  0x26   :  { %1844 = shalt.err (!%p1841_p1)
}
  0x27   :  { %76 = dma.hbm_to_vmem [thread:$0]  %s2478_s5, 16, %s2127_s16, [#allocation12]  }
  0x28   :  { %s2039_s24 = smov [#allocation5]   ;;  %s2040_s28 = smov [#allocation10]  }
  0x29   :  { %s32_s27 = sshll.u32 %s2039_s24, 4  ;;  %s56_s29 = sshll.u32 %s2040_s28, 4  ;;  %s33_s27 = int_to_ptr.vmem [resolvable:$true] %s32_s27  ;;  %s2162_s29 = int_to_ptr.vmem [resolvable:$true] %s56_s29 }
  0x2a   :  { %s1845_s18 = scalar_lea.hbm %s2473_s0, 512 }
  0x2b   :  { %p1846_p2 = scmp.ne.s32.totalorder %s2473_s0, %s1845_s18  ;;  %p1849_p3 = scmp.lt.u32.totalorder %s1845_s18, %s2473_s0 }
  0x2d   :  { %p1851_p4 = pnand %p1849_p3, %p1846_p2 }
  0x2f   :  { %1854 = shalt.err (!%p1851_p4)
}
  0x30   :  { %s1855_s5 = scalar_lea.vmem %s33_s27, 512  ;;  %p1860_p6 = scmp.lt.s32.totalorder %s33_s27, %s33_s27 }
  0x31   :  { %p1856_p5 = scmp.ne.s32.totalorder %s33_s27, %s1855_s5  ;;  %p1861_p7 = scmp.lt.s32.totalorder %s1855_s5, %s1855_s5 }
  0x33   :  { %p1862_p8 = por %p1861_p7, %p1860_p6 }
  0x35   :  { %p1863_p9 = pnand %p1862_p8, %p1856_p5 }
  0x37   :  { %1866 = shalt.err (!%p1863_p9)
}
  0x38   :  { %38 = dma.hbm_to_vmem [thread:$0]  %s2473_s0, 512, %s33_s27, [#allocation6], %s2037_s25, %s2037_s25, %s2038_s26  }
  0x39   :  { %s1867_s24 = scalar_lea.hbm %s2475_s2, 1024 }
  0x3a   :  { %p1868_p10 = scmp.ne.s32.totalorder %s2475_s2, %s1867_s24  ;;  %p1871_p11 = scmp.lt.u32.totalorder %s1867_s24, %s2475_s2 }
  0x3c   :  { %p1873_p12 = pnand %p1871_p11, %p1868_p10 }
  0x3e   :  { %1876 = shalt.err (!%p1873_p12)
}
  0x3f   :  { %s1877_s19 = scalar_lea.vmem %s2162_s29, 1024  ;;  %p1882_p0 = scmp.lt.s32.totalorder %s2162_s29, %s2162_s29 }
  0x40   :  { %p1878_p13 = scmp.ne.s32.totalorder %s2162_s29, %s1877_s19  ;;  %p1883_p1 = scmp.lt.s32.totalorder %s1877_s19, %s1877_s19 }
  0x42   :  { %p1884_p2 = por %p1883_p1, %p1882_p0 }
  0x44   :  { %p1885_p3 = pnand %p1884_p2, %p1878_p13 }
  0x46   :  { %1888 = shalt.err (!%p1885_p3)
}
  0x47   :  { %62 = dma.hbm_to_vmem [thread:$0]  %s2475_s2, 1024, %s2162_s29, [#allocation9], %s2037_s25, %s2037_s25, %s2038_s26  }
  0x48   :  { %s2041_s20 = smov [#allocation13]   ;;  %s2042_s22 = smov [#allocation14]  }
  0x49   :  { %s83_s21 = sshll.u32 %s2041_s20, 4  ;;  %s93_s5 = sshll.u32 %s2042_s22, 4  ;;  %s84_s21 = int_to_ptr.vmem [resolvable:$true] %s83_s21  ;;  %s94_s5 = int_to_ptr.vmem [resolvable:$true] %s93_s5 }
  0x4a   :  { %s1889_s30 = scalar_lea.hbm %s2479_s6, 16 }
  0x4b   :  { %p1890_p4 = scmp.ne.s32.totalorder %s2479_s6, %s1889_s30  ;;  %p1893_p5 = scmp.lt.u32.totalorder %s1889_s30, %s2479_s6 }
  0x4d   :  { %p1895_p6 = pnand %p1893_p5, %p1890_p4 }
  0x4f   :  { %1898 = shalt.err (!%p1895_p6)
}
  0x50   :  { %s1899_s2 = scalar_lea.vmem %s84_s21, 16  ;;  %s1903_s25 = scalar_lea.vmem %s84_s21, 32 }
  0x51   :  { %p1900_p7 = scmp.ne.s32.totalorder %s84_s21, %s1899_s2  ;;  %p1904_p8 = scmp.lt.s32.totalorder %s84_s21, %s84_s21 }
  0x52   :  { %p1905_p9 = scmp.lt.s32.totalorder %s1903_s25, %s1899_s2 }
  0x54   :  { %p1906_p10 = por %p1905_p9, %p1904_p8 }
  0x56   :  { %p1907_p11 = pnand %p1906_p10, %p1900_p7 }
  0x58   :  { %1910 = shalt.err (!%p1907_p11)
}
  0x59   :  { %86 = dma.hbm_to_vmem [thread:$0]  %s2479_s6, 16, %s84_s21, [#allocation12]  }
  0x5a   :  { %s1911_s19 = scalar_lea.hbm %s2480_s7, 16 }
  0x5b   :  { %p1912_p12 = scmp.ne.s32.totalorder %s2480_s7, %s1911_s19  ;;  %p1915_p13 = scmp.lt.u32.totalorder %s1911_s19, %s2480_s7 }
  0x5d   :  { %p1917_p0 = pnand %p1915_p13, %p1912_p12 }
  0x5f   :  { %1920 = shalt.err (!%p1917_p0)
}
  0x60   :  { %s1921_s16 = scalar_lea.vmem %s94_s5, 16  ;;  %s1925_s1 = scalar_lea.vmem %s94_s5, 32 }
  0x61   :  { %p1922_p1 = scmp.ne.s32.totalorder %s94_s5, %s1921_s16  ;;  %p1926_p2 = scmp.lt.s32.totalorder %s94_s5, %s94_s5 }
  0x62   :  { %p1927_p3 = scmp.lt.s32.totalorder %s1925_s1, %s1921_s16 }
  0x64   :  { %p1928_p4 = por %p1927_p3, %p1926_p2 }
  0x66   :  { %p1929_p5 = pnand %p1928_p4, %p1922_p1 }
  0x68   :  { %1932 = shalt.err (!%p1929_p5)
}
  0x69   :  { %96 = dma.hbm_to_vmem [thread:$0]  %s2480_s7, 16, %s94_s5, [#allocation15]  }
  0x6a   :  { %2021 = dma.done.wait [#allocation6], 512  }
  0x6b   :  { %2022 = vsyncadd [#allocation6], 4294966784 }
  0x6c   :  { %2023 = dma.done.wait [#allocation9], 1536  }
  0x6d   :  { %2024 = vsyncadd [#allocation9], 4294965760 }
  0x6e   :  { %2025 = dma.done.wait [#allocation12], 32  }
  0x6f   :  { %2026 = vsyncadd [#allocation12], 4294967264 }
  0x70   :  { %2027 = dma.done.wait [#allocation15], 16  }
  0x71   :  { %2028 = vsyncadd [#allocation15], 4294967280  ;;  %v2043_v0 = vmov 0.0   ;;  %vm2044_vm0 = vmmov 0   ;;  %v1729_v1 = vld [vmem:[#allocation10] sm:$0xff]   ;;  %v1730_v2 = vld [vmem:[#allocation10 + $0x8] sm:$0xff]  }
  0x72   :  { %1552 = vmatprep.subr.bf16.mxu1 %v2043_v0  ;;  %1568 = vmatprep.mubr.msk.bf16.mxu1 %vm2044_vm0, %v2043_v0  ;;  %v1732_v3 = vld [vmem:[#allocation8] sm:$0xff]   ;;  %v1734_v4 = vld [vmem:[#allocation8 + $0x8] sm:$0xff]   ;;  %v1731_v5 = vld [vmem:[#allocation10 + $0x10] sm:$0xff]   ;;  %vm199_vm1 = vcmask 523264   ;;  %v2045_v61 = vmov 1.0|1.0  }
  0x73   :  { %1553 = vmatpush3.bf16.msra.mxu1 %v1729_v1  ;;  %1536 = vmatprep.subr.bf16.mxu0 %v1732_v3  ;;  %v1736_v6 = vld [vmem:[#allocation8 + $0x10] sm:$0xff]   ;;  %v1733_v7 = vld [vmem:[#allocation10 + $0x18] sm:$0xff]   ;;  %v1739_v8 = vld [vmem:[#allocation5] sm:$0xff]  }
  0x74   :  { %1554 = vmatprep.subr.bf16.mxu1 %v2043_v0  ;;  %1537 = vmatpush3.bf16.msra.mxu0 %v1732_v3  ;;  %v1738_v9 = vld [vmem:[#allocation8 + $0x18] sm:$0xff]   ;;  %v1735_v10 = vld [vmem:[#allocation10 + $0x20] sm:$0xff]   ;;  %v1737_v11 = vld [vmem:[#allocation10 + $0x28] sm:$0xff]  }
  0x75   :  { %1538 = vmatprep.subr.bf16.mxu0 %v1734_v4  ;;  %1544 = vmatprep.mubr.msk.bf16.mxu0 %vm199_vm1, %v1739_v8  ;;  %v1741_v12 = vld [vmem:[#allocation5 + $0x8] sm:$0xff]   ;;  %v1743_v13 = vld [vmem:[#allocation10] sm:$0xff]   ;;  %v1740_v14 = vld [vmem:[#allocation10 + $0x30] sm:$0xff]  }
  0x76   :  { %v1744_v15 = vld [vmem:[#allocation10 + $0x8] sm:$0xff]   ;;  %v1742_v16 = vld [vmem:[#allocation10 + $0x38] sm:$0xff]   ;;  %v2239_v17 = vld [vmem:[%s2482_s9] sm:$0xff] }
  0x77   :  { %1555 = vmatpush3.bf16.msra.mxu1 %v1730_v2  ;;  %v1745_v18 = vld [vmem:[#allocation10 + $0x10] sm:$0xff]   ;;  %v284_v19 = vpack.c.bf16 %v2239_v17, %v2239_v17  ;;  %v1746_v20 = vld [vmem:[#allocation10 + $0x18] sm:$0xff]   ;;  %v1747_v21 = vld [vmem:[#allocation10 + $0x20] sm:$0xff]  }
  0x78   :  { %1556 = vmatprep.subr.bf16.mxu1 %v2043_v0  ;;  %1539 = vmatpush3.bf16.msra.mxu0 %v1734_v4  ;;  %v1748_v22 = vld [vmem:[#allocation5 + $0x10] sm:$0xff]   ;;  %v1749_v23 = vld [vmem:[#allocation5 + $0x18] sm:$0xff]   ;;  %v1750_v24 = vld [vmem:[#allocation10 + $0x28] sm:$0xff]  }
  0x79   :  { %1540 = vmatprep.subr.bf16.mxu0 %v1736_v6  ;;  %v1751_v25 = vld [vmem:[#allocation10 + $0x30] sm:$0xff]   ;;  %v1752_v26 = vld [vmem:[#allocation10 + $0x38] sm:$0xff]   ;;  %v1753_v27 = vld [vmem:[#allocation10] sm:$0xff]  }
  0x7a   :  { %v1754_v28 = vld [vmem:[#allocation10 + $0x8] sm:$0xff]   ;;  %v1755_v29 = vld [vmem:[#allocation10 + $0x10] sm:$0xff]   ;;  %v1756_v30 = vld [vmem:[#allocation10 + $0x18] sm:$0xff]  }
  0x7b   :  { %1557 = vmatpush3.bf16.msra.mxu1 %v1731_v5  ;;  %v1757_v31 = vld [vmem:[#allocation10 + $0x20] sm:$0xff]   ;;  %v1758_v3 = vld [vmem:[#allocation10 + $0x28] sm:$0xff]   ;;  %v1759_v4 = vld [vmem:[#allocation10 + $0x30] sm:$0xff]  }
  0x7c   :  { %1558 = vmatprep.subr.bf16.mxu1 %v2043_v0  ;;  %1541 = vmatpush3.bf16.msra.mxu0 %v1736_v6  ;;  %v130_v32 = vld [vmem:[%s2483_s10] sm:$0xff]  ;;  %v1760_v5 = vld [vmem:[#allocation10 + $0x38] sm:$0xff]   ;;  %v1763_v8 = vld [vmem:[#allocation10 + $0x10] sm:$0xff]  }
  0x7d   :  { %1542 = vmatprep.subr.bf16.mxu0 %v1738_v9  ;;  %v2266_v33 = vld [vmem:[#allocation13] ss:$0 sm:$0xff]  ;;  %v2268_v34 = vld [vmem:[#allocation14] ss:$0 sm:$0xff]  ;;  %v2280_v42 = vld [vmem:[%s2476_s3] ss:$0 sm:$0xff] }
  0x7e   :  { %v396_v35 = vmul.f32 %v2266_v33, %v130_v32  ;;  %v403_v36 = vmul.f32 %v2268_v34, %v2239_v17  ;;  %v126_v45 = vld [vmem:[%s2481_s8] sm:$0xff]  ;;  %s2046_s3 = smov [#allocation20]  }
  0x7f   :  { %1559 = vmatpush3.bf16.msra.mxu1 %v1733_v7  ;;  %v2289_v46 = vld [vmem:[%s2477_s4] ss:$0 sm:$0xff]  ;;  %v1762_v7 = vld [vmem:[#allocation10 + $0x8] sm:$0xff]   ;;  %s1330_s4 = sshll.u32 %s2046_s3, 4  ;;  %s1331_s4 = int_to_ptr.vmem [resolvable:$true] %s1330_s4 }
  0x80   :  { %1560 = vmatprep.subr.bf16.mxu1 %v2043_v0  ;;  %1543 = vmatpush3.bf16.msra.mxu0 %v1738_v9  ;;  %v404_v40 = vadd.f32 %v403_v36, %v396_v35  ;;  %v2291_v48 = vld [vmem:[#allocation11] ss:$0 sm:$0xff]  ;;  %v413_v51 = vmul.f32 %v2289_v46, %v126_v45  ;;  %v1764_v9 = vld [vmem:[#allocation10 + $0x18] sm:$0xff]   ;;  %v1771_v45 = vld [vmem:[#allocation10 + $0x10] sm:$0xff]   ;;  %s1933_s8 = scalar_lea.vmem %s1331_s4, 128  ;;  %p1938_p7 = scmp.lt.s32.totalorder %s1331_s4, %s1331_s4 }
  0x81   :  { %1572 = vmatprep.subr.bf16.mxu0 %v2043_v0  ;;  %v1761_v6 = vld [vmem:[#allocation10] sm:$0xff]   ;;  %p1934_p6 = scmp.ne.s32.totalorder %s1331_s4, %s1933_s8  ;;  %p1939_p8 = scmp.lt.s32.totalorder %s1933_s8, %s1933_s8 }
  0x82   :  { %v405_v43 = vmul.f32 1.8, %v404_v40 }
  0x83   :  { %1561 = vmatpush3.bf16.msra.mxu1 %v1735_v10  ;;  %1545 = vmatmul.mubr.msk.bf16.vlgmr.msra.gmra.mrb[0].mxu0 %vm199_vm1, %v1741_v12  ;;  %v1765_v10 = vld [vmem:[#allocation10 + $0x20] sm:$0xff]   ;;  %p1940_p9 = por %p1939_p8, %p1938_p7 }
  0x84   :  { %1562 = vmatprep.subr.bf16.mxu1 %v2043_v0  ;;  %1573 = vmatpush3.bf16.msra.mxu0 %v1743_v13  ;;  %v406_v47 = vadd.f32 0.01, %v405_v43  ;;  %v1769_v43 = vld [vmem:[#allocation10] sm:$0xff]  }
  0x85   :  { %1574 = vmatprep.subr.bf16.mxu0 %v2043_v0  ;;  %1548 = vmatprep.mubr.msk.bf16.mxu0 %vm199_vm1, %v1748_v22  ;;  %p1941_p10 = pnand %p1940_p9, %p1934_p6 }
  0x86   :  { %v422_v55 = vmul.f32 %v406_v47, %v2239_v17 }
  0x87   :  { %1563 = vmatpush3.bf16.msra.mxu1 %v1737_v11  ;;  %v535_v11 = vmul.f32 %v2266_v33, %v404_v40  ;;  %v1767_v40 = vld [vmem:[#allocation10 + $0x30] sm:$0xff]  }
  0x88   :  { %1564 = vmatprep.subr.bf16.mxu1 %v2043_v0  ;;  %1575 = vmatpush3.bf16.msra.mxu0 %v1744_v15 }
  0x89   :  { %1576 = vmatprep.subr.bf16.mxu0 %v2043_v0 }
  0x8b   :  { %1565 = vmatpush3.bf16.msra.mxu1 %v1740_v14  ;;  %1549 = vmatmul.mubr.msk.bf16.gmra.mrb[4].mxu0 %vm199_vm1, %v1749_v23 }
  0x8c   :  { %1566 = vmatprep.subr.bf16.mxu1 %v2043_v0  ;;  %1577 = vmatpush3.bf16.msra.mxu0 %v1745_v18 }
  0x8d   :  { %1578 = vmatprep.subr.bf16.mxu0 %v2043_v0  ;;  %1588 = vmatprep.mubr.msk.bf16.mxu0 %vm2044_vm0, %v2043_v0 }
  0x8f   :  { %1567 = vmatpush3.bf16.msra.mxu1 %v1742_v16 }
  0x90   :  { %1592 = vmatprep.subr.bf16.mxu1 %v2043_v0  ;;  %1579 = vmatpush3.bf16.msra.mxu0 %v1746_v20 }
  0x91   :  { %1580 = vmatprep.subr.bf16.mxu0 %v2043_v0 }
  0x92   :  { %1569 = vmatmul.mubr.bf16.vlgmr.msra.gmra.mrb[0].mxu1 %v284_v19 }
  0x93   :  { %1608 = vmatprep.mubr.msk.bf16.mxu1 %vm2044_vm0, %v2043_v0  ;;  %1593 = vmatpush3.bf16.msra.mxu1 %v1753_v27 }
  0x94   :  { %1581 = vmatpush3.bf16.msra.mxu0 %v1747_v21  ;;  %1594 = vmatprep.subr.bf16.mxu1 %v2043_v0 }
  0x95   :  { %1582 = vmatprep.subr.bf16.mxu0 %v2043_v0 }
  0x97   :  { %1595 = vmatpush3.bf16.msra.mxu1 %v1754_v28 }
  0x98   :  { %1583 = vmatpush3.bf16.msra.mxu0 %v1750_v24  ;;  %1596 = vmatprep.subr.bf16.mxu1 %v2043_v0 }
  0x99   :  { %1584 = vmatprep.subr.bf16.mxu0 %v2043_v0 }
  0x9b   :  { %1597 = vmatpush3.bf16.msra.mxu1 %v1755_v29 }
  0x9c   :  { %1585 = vmatpush3.bf16.msra.mxu0 %v1751_v25  ;;  %1598 = vmatprep.subr.bf16.mxu1 %v2043_v0 }
  0x9d   :  { %1586 = vmatprep.subr.bf16.mxu0 %v2043_v0 }
  0x9f   :  { %1599 = vmatpush3.bf16.msra.mxu1 %v1756_v30 }
  0xa0   :  { %1587 = vmatpush3.bf16.msra.mxu0 %v1752_v26  ;;  %1600 = vmatprep.subr.bf16.mxu1 %v2043_v0 }
  0xa1   :  { %1612 = vmatprep.subr.bf16.mxu0 %v2043_v0 }
  0xa3   :  { %1601 = vmatpush3.bf16.msra.mxu1 %v1757_v31 }
  0xa4   :  { %1602 = vmatprep.subr.bf16.mxu1 %v2043_v0 }
  0xa7   :  { %1603 = vmatpush3.bf16.msra.mxu1 %v1758_v3 }
  0xa8   :  { %1604 = vmatprep.subr.bf16.mxu1 %v2043_v0 }
  0xab   :  { %1605 = vmatpush3.bf16.msra.mxu1 %v1759_v4 }
  0xac   :  { %1606 = vmatprep.subr.bf16.mxu1 %v2043_v0 }
  0xaf   :  { %1607 = vmatpush3.bf16.msra.mxu1 %v1760_v5 }
  0xb0   :  { %1632 = vmatprep.subr.bf16.mxu1 %v2043_v0 }
 0x156   :  { %v2273_v37 = vpop.f32.mrb[0].mxu0 }
 0x157   :  { %v246_v38 = vpop.f32.mrb[1].mxu0 }
 0x158   :  { %v2275_v39 = vpop.f32.mrb[2].mxu0  ;;  %v247_v44 = vadd.f32 %v2280_v42, %v246_v38  ;;  %v1766_v38 = vld [vmem:[#allocation10 + $0x28] sm:$0xff]  }
 0x159   :  { %v249_v41 = vpop.f32.mrb[3].mxu0 }
 0x15a   :  { %v250_v15 = vadd.f32 %v2280_v42, %v249_v41  ;;  %v1768_v41 = vld [vmem:[#allocation10 + $0x38] sm:$0xff]  }
 0x15e   :  { %v2300_v62 = vpop.f32.mrb[4].mxu0 }
 0x15f   :  { %v2302_v63 = vpop.f32.mrb[5].mxu0 }
 0x160   :  { %v2304_v1 = vpop.f32.mrb[6].mxu0 }
 0x161   :  { %v2306_v2 = vpop.f32.mrb[7].mxu0 }
 0x165   :  { %v383_v49 = vpop.f32.mrb[0].mxu1 }
 0x166   :  { %v389_v50 = vadd.f32 %v383_v49, %v247_v44  ;;  %v1570_v52 = vpop.f32.mrb[1].mxu1  ;;  %v1770_v44 = vld [vmem:[#allocation10 + $0x8] sm:$0xff]   ;;  %v1773_v49 = vld [vmem:[#allocation10 + $0x20] sm:$0xff]  }
 0x167   :  { %v386_v53 = vpop.f32.mrb[2].mxu1 }
 0x168   :  { %v420_v54 = vmul.f32 %v2291_v48, %v389_v50  ;;  %v1571_v56 = vpop.f32.mrb[3].mxu1  ;;  %v255_v50 = vadd.f32 %v2273_v37, %v2280_v42 }
 0x16a   :  { %v421_v57 = vadd.f32 %v420_v54, %v413_v51 }
 0x16c   :  { %v423_v58 = vsub.f32 %v421_v57, %v422_v55 }
 0x16e   :  { %v424_v59 = vsub.f32 %v423_v58, %v406_v47  ;;  %v540_v21 = vmul.f32 %v2289_v46, %v423_v58  ;;  %v1772_v47 = vld [vmem:[#allocation10 + $0x18] sm:$0xff]  }
 0x170   :  { %vm425_vm2 = vcmp.gt.f32.partialorder %v424_v59, 0.0 }
 0x171   :  { %v1378_v60 = vsel %vm425_vm2, 1.0, %v2043_v0  ;;  %vm1387_vm3 = vmpackc.low %vm425_vm2, %vm425_vm2 }
 0x172   :  { %428 = vst [vmem:[#allocation16] sm:$0xff] %v1378_v60  ;;  %1589 = vmatmul.mubr.msk.bf16.vlgmr.msra.gmra.mrb[8].mxu0 %vm1387_vm3, %v2045_v61  ;;  %v536_v12 = vmul.f32 %v1378_v60, %v2268_v34 }
 0x173   :  { %1628 = vmatprep.mubr.msk.bf16.mxu0 %vm2044_vm0, %v2043_v0  ;;  %1613 = vmatpush3.bf16.msra.mxu0 %v1761_v6 }
 0x174   :  { %1614 = vmatprep.subr.bf16.mxu0 %v2043_v0  ;;  %v537_v13 = vadd.f32 %v536_v12, %v535_v11  ;;  %v1776_v11 = vld [vmem:[#allocation10 + $0x38] sm:$0xff]   ;;  %v1777_v12 = vld [vmem:[#allocation10] sm:$0xff]  }
 0x176   :  { %v538_v14 = vmul.f32 1.8, %v537_v13  ;;  %v657_v29 = vmul.f32 %v2266_v33, %v537_v13  ;;  %v1778_v13 = vld [vmem:[#allocation10 + $0x8] sm:$0xff]  }
 0x177   :  { %1615 = vmatpush3.bf16.msra.mxu0 %v1762_v7 }
 0x178   :  { %1616 = vmatprep.subr.bf16.mxu0 %v2043_v0  ;;  %v539_v18 = vadd.f32 0.01, %v538_v14  ;;  %v1779_v14 = vld [vmem:[#allocation10 + $0x10] sm:$0xff]  }
 0x17a   :  { %v543_v25 = vmul.f32 %v1378_v60, %v539_v18 }
 0x17b   :  { %1617 = vmatpush3.bf16.msra.mxu0 %v1763_v8 }
 0x17c   :  { %1618 = vmatprep.subr.bf16.mxu0 %v2043_v0 }
 0x17f   :  { %1619 = vmatpush3.bf16.msra.mxu0 %v1764_v9  ;;  %v1774_v9 = vld [vmem:[#allocation10 + $0x28] sm:$0xff]  }
 0x180   :  { %1620 = vmatprep.subr.bf16.mxu0 %v2043_v0 }
 0x183   :  { %1621 = vmatpush3.bf16.msra.mxu0 %v1765_v10  ;;  %v1775_v10 = vld [vmem:[#allocation10 + $0x30] sm:$0xff]  }
 0x184   :  { %1622 = vmatprep.subr.bf16.mxu0 %v2043_v0 }
 0x187   :  { %1623 = vmatpush3.bf16.msra.mxu0 %v1766_v38  ;;  %v1783_v38 = vld [vmem:[#allocation10 + $0x30] sm:$0xff]  }
 0x188   :  { %1624 = vmatprep.subr.bf16.mxu0 %v2043_v0 }
 0x18b   :  { %1625 = vmatpush3.bf16.msra.mxu0 %v1767_v40  ;;  %v1784_v40 = vld [vmem:[#allocation10 + $0x38] sm:$0xff]  }
 0x18c   :  { %1626 = vmatprep.subr.bf16.mxu0 %v2043_v0 }
 0x18f   :  { %1627 = vmatpush3.bf16.msra.mxu0 %v1768_v41  ;;  %v1785_v41 = vld [vmem:[#allocation10] sm:$0xff]  }
 0x190   :  { %1652 = vmatprep.subr.bf16.mxu0 %v2043_v0 }
 0x245   :  { %v528_v16 = vpop.f32.mrb[8].mxu0 }
 0x246   :  { %v534_v17 = vadd.f32 %v528_v16, %v250_v15  ;;  %v1590_v19 = vpop.f32.mrb[9].mxu0  ;;  %v1780_v15 = vld [vmem:[#allocation10 + $0x18] sm:$0xff]   ;;  %v1781_v16 = vld [vmem:[#allocation10 + $0x20] sm:$0xff]  }
 0x247   :  { %v531_v20 = vpop.f32.mrb[10].mxu0 }
 0x248   :  { %v541_v22 = vmul.f32 %v2291_v48, %v534_v17  ;;  %v1591_v23 = vpop.f32.mrb[11].mxu0  ;;  %v258_v17 = vadd.f32 %v2275_v39, %v2280_v42 }
 0x24a   :  { %v542_v24 = vadd.f32 %v541_v22, %v540_v21 }
 0x24c   :  { %v544_v26 = vsub.f32 %v542_v24, %v543_v25 }
 0x24e   :  { %v545_v27 = vsub.f32 %v544_v26, %v539_v18  ;;  %v662_v55 = vmul.f32 %v2289_v46, %v544_v26 }
 0x250   :  { %vm546_vm4 = vcmp.gt.f32.partialorder %v545_v27, 0.0 }
 0x251   :  { %v1389_v28 = vsel %vm546_vm4, 1.0, %v2043_v0  ;;  %vm1398_vm5 = vmpackc.low %vm546_vm4, %vm546_vm4 }
 0x252   :  { %550 = vst [vmem:[#allocation16 + $0x8] sm:$0xff] %v1389_v28  ;;  %1609 = vmatmul.mubr.msk.bf16.vlgmr.msra.gmra.mrb[4].mxu1 %vm1398_vm5, %v2045_v61  ;;  %v658_v30 = vmul.f32 %v1389_v28, %v2268_v34 }
 0x253   :  { %1648 = vmatprep.mubr.msk.bf16.mxu1 %vm2044_vm0, %v2043_v0  ;;  %1633 = vmatpush3.bf16.msra.mxu1 %v1769_v43  ;;  %v1786_v43 = vld [vmem:[#allocation10 + $0x8] sm:$0xff]  }
 0x254   :  { %v659_v31 = vadd.f32 %v658_v30, %v657_v29  ;;  %1634 = vmatprep.subr.bf16.mxu1 %v2043_v0 }
 0x256   :  { %v660_v32 = vmul.f32 1.8, %v659_v31  ;;  %v779_v37 = vmul.f32 %v2266_v33, %v659_v31 }
 0x257   :  { %1635 = vmatpush3.bf16.msra.mxu1 %v1770_v44  ;;  %v1787_v44 = vld [vmem:[#allocation10 + $0x10] sm:$0xff]  }
 0x258   :  { %v661_v35 = vadd.f32 0.01, %v660_v32  ;;  %1636 = vmatprep.subr.bf16.mxu1 %v2043_v0 }
 0x25a   :  { %v665_v36 = vmul.f32 %v1389_v28, %v661_v35 }
 0x25b   :  { %1637 = vmatpush3.bf16.msra.mxu1 %v1771_v45  ;;  %v1788_v45 = vld [vmem:[#allocation10 + $0x18] sm:$0xff]  }
 0x25c   :  { %1638 = vmatprep.subr.bf16.mxu1 %v2043_v0 }
 0x25f   :  { %1639 = vmatpush3.bf16.msra.mxu1 %v1772_v47  ;;  %v1789_v47 = vld [vmem:[#allocation10 + $0x20] sm:$0xff]  }
 0x260   :  { %1640 = vmatprep.subr.bf16.mxu1 %v2043_v0 }
 0x263   :  { %1641 = vmatpush3.bf16.msra.mxu1 %v1773_v49  ;;  %v263_v49 = vadd.f32 %v2280_v42, %v2302_v63 }
 0x264   :  { %1642 = vmatprep.subr.bf16.mxu1 %v2043_v0 }
 0x267   :  { %1643 = vmatpush3.bf16.msra.mxu1 %v1774_v9  ;;  %v1792_v9 = vld [vmem:[#allocation10 + $0x38] sm:$0xff]  }
 0x268   :  { %1644 = vmatprep.subr.bf16.mxu1 %v2043_v0 }
 0x26b   :  { %1645 = vmatpush3.bf16.msra.mxu1 %v1775_v10  ;;  %v1793_v10 = vld [vmem:[#allocation10] sm:$0xff]  }
 0x26c   :  { %1646 = vmatprep.subr.bf16.mxu1 %v2043_v0 }
 0x26f   :  { %1647 = vmatpush3.bf16.msra.mxu1 %v1776_v11  ;;  %v1794_v11 = vld [vmem:[#allocation10 + $0x8] sm:$0xff]  }
 0x270   :  { %1672 = vmatprep.subr.bf16.mxu1 %v2043_v0 }
 0x325   :  { %v650_v51 = vpop.f32.mrb[4].mxu1 }
 0x326   :  { %v656_v52 = vadd.f32 %v650_v51, %v255_v50  ;;  %v1610_v53 = vpop.f32.mrb[5].mxu1 }
 0x327   :  { %v653_v54 = vpop.f32.mrb[6].mxu1 }
 0x328   :  { %v663_v56 = vmul.f32 %v2291_v48, %v656_v52  ;;  %v1611_v57 = vpop.f32.mrb[7].mxu1 }
 0x32a   :  { %v664_v58 = vadd.f32 %v663_v56, %v662_v55 }
 0x32c   :  { %v666_v59 = vsub.f32 %v664_v58, %v665_v36  ;;  %v1782_v36 = vld [vmem:[#allocation10 + $0x28] sm:$0xff]  }
 0x32e   :  { %v667_v60 = vsub.f32 %v666_v59, %v661_v35  ;;  %v784_v22 = vmul.f32 %v2289_v46, %v666_v59 }
 0x330   :  { %vm668_vm6 = vcmp.gt.f32.partialorder %v667_v60, 0.0 }
 0x331   :  { %v1400_v3 = vsel %vm668_vm6, 1.0, %v2043_v0  ;;  %vm1409_vm7 = vmpackc.low %vm668_vm6, %vm668_vm6 }
 0x332   :  { %672 = vst [vmem:[#allocation16 + $0x10] sm:$0xff] %v1400_v3  ;;  %1629 = vmatmul.mubr.msk.bf16.vlgmr.msra.gmra.mrb[12].mxu0 %vm1409_vm7, %v2045_v61  ;;  %v780_v4 = vmul.f32 %v1400_v3, %v2268_v34 }
 0x333   :  { %1668 = vmatprep.mubr.msk.bf16.mxu0 %vm2044_vm0, %v2043_v0  ;;  %1653 = vmatpush3.bf16.msra.mxu0 %v1777_v12  ;;  %v1795_v12 = vld [vmem:[#allocation10 + $0x10] sm:$0xff]  }
 0x334   :  { %v781_v5 = vadd.f32 %v780_v4, %v779_v37  ;;  %1654 = vmatprep.subr.bf16.mxu0 %v2043_v0 }
 0x336   :  { %v782_v6 = vmul.f32 1.8, %v781_v5  ;;  %v901_v39 = vmul.f32 %v2266_v33, %v781_v5 }
 0x337   :  { %1655 = vmatpush3.bf16.msra.mxu0 %v1778_v13  ;;  %v1796_v13 = vld [vmem:[#allocation10 + $0x18] sm:$0xff]  }
 0x338   :  { %v783_v7 = vadd.f32 0.01, %v782_v6  ;;  %1656 = vmatprep.subr.bf16.mxu0 %v2043_v0 }
 0x33a   :  { %v787_v8 = vmul.f32 %v1400_v3, %v783_v7 }
 0x33b   :  { %1657 = vmatpush3.bf16.msra.mxu0 %v1779_v14  ;;  %v1797_v14 = vld [vmem:[#allocation10 + $0x20] sm:$0xff]  }
 0x33c   :  { %1658 = vmatprep.subr.bf16.mxu0 %v2043_v0 }
 0x33f   :  { %1659 = vmatpush3.bf16.msra.mxu0 %v1780_v15  ;;  %v266_v15 = vadd.f32 %v2280_v42, %v2306_v2 }
 0x340   :  { %1660 = vmatprep.subr.bf16.mxu0 %v2043_v0 }
 0x343   :  { %1661 = vmatpush3.bf16.msra.mxu0 %v1781_v16 }
 0x344   :  { %1662 = vmatprep.subr.bf16.mxu0 %v2043_v0 }
 0x347   :  { %1663 = vmatpush3.bf16.msra.mxu0 %v1782_v36  ;;  %v271_v36 = vadd.f32 %v2300_v62, %v2280_v42 }
 0x348   :  { %1664 = vmatprep.subr.bf16.mxu0 %v2043_v0 }
 0x34b   :  { %1665 = vmatpush3.bf16.msra.mxu0 %v1783_v38 }
 0x34c   :  { %1666 = vmatprep.subr.bf16.mxu0 %v2043_v0 }
 0x34f   :  { %1667 = vmatpush3.bf16.msra.mxu0 %v1784_v40 }
 0x350   :  { %1692 = vmatprep.subr.bf16.mxu0 %v2043_v0 }
 0x405   :  { %v772_v18 = vpop.f32.mrb[12].mxu0 }
 0x406   :  { %v778_v19 = vadd.f32 %v772_v18, %v258_v17  ;;  %v1630_v20 = vpop.f32.mrb[13].mxu0 }
 0x407   :  { %v775_v21 = vpop.f32.mrb[14].mxu0 }
 0x408   :  { %v785_v23 = vmul.f32 %v2291_v48, %v778_v19  ;;  %v1631_v24 = vpop.f32.mrb[15].mxu0 }
 0x40a   :  { %v786_v25 = vadd.f32 %v785_v23, %v784_v22 }
 0x40c   :  { %v788_v26 = vsub.f32 %v786_v25, %v787_v8  ;;  %v1791_v8 = vld [vmem:[#allocation10 + $0x30] sm:$0xff]  }
 0x40e   :  { %v789_v27 = vsub.f32 %v788_v26, %v783_v7  ;;  %v906_v54 = vmul.f32 %v2289_v46, %v788_v26  ;;  %v1790_v7 = vld [vmem:[#allocation10 + $0x28] sm:$0xff]  }
 0x410   :  { %vm790_vm8 = vcmp.gt.f32.partialorder %v789_v27, 0.0 }
 0x411   :  { %v1411_v28 = vsel %vm790_vm8, 1.0, %v2043_v0  ;;  %vm1420_vm9 = vmpackc.low %vm790_vm8, %vm790_vm8 }
 0x412   :  { %794 = vst [vmem:[#allocation16 + $0x18] sm:$0xff] %v1411_v28  ;;  %1649 = vmatmul.mubr.msk.bf16.vlgmr.msra.gmra.mrb[8].mxu1 %vm1420_vm9, %v2045_v61  ;;  %v902_v29 = vmul.f32 %v1411_v28, %v2268_v34 }
 0x413   :  { %1688 = vmatprep.mubr.msk.bf16.mxu1 %vm2044_vm0, %v2043_v0  ;;  %1673 = vmatpush3.bf16.msra.mxu1 %v1785_v41 }
 0x414   :  { %v903_v30 = vadd.f32 %v902_v29, %v901_v39  ;;  %1674 = vmatprep.subr.bf16.mxu1 %v2043_v0 }
 0x416   :  { %v904_v31 = vmul.f32 1.8, %v903_v30  ;;  %v1023_v63 = vmul.f32 %v2266_v33, %v903_v30 }
 0x417   :  { %1675 = vmatpush3.bf16.msra.mxu1 %v1786_v43 }
 0x418   :  { %v905_v32 = vadd.f32 0.01, %v904_v31  ;;  %1676 = vmatprep.subr.bf16.mxu1 %v2043_v0  ;;  %v1798_v31 = vld [vmem:[#allocation10 + $0x28] sm:$0xff]  }
 0x41a   :  { %v909_v35 = vmul.f32 %v1411_v28, %v905_v32 }
 0x41b   :  { %1677 = vmatpush3.bf16.msra.mxu1 %v1787_v44 }
 0x41c   :  { %1678 = vmatprep.subr.bf16.mxu1 %v2043_v0 }
 0x41f   :  { %1679 = vmatpush3.bf16.msra.mxu1 %v1788_v45 }
 0x420   :  { %1680 = vmatprep.subr.bf16.mxu1 %v2043_v0 }
 0x423   :  { %1681 = vmatpush3.bf16.msra.mxu1 %v1789_v47 }
 0x424   :  { %1682 = vmatprep.subr.bf16.mxu1 %v2043_v0 }
 0x427   :  { %1683 = vmatpush3.bf16.msra.mxu1 %v1790_v7 }
 0x428   :  { %1684 = vmatprep.subr.bf16.mxu1 %v2043_v0 }
 0x42b   :  { %1685 = vmatpush3.bf16.msra.mxu1 %v1791_v8 }
 0x42c   :  { %1686 = vmatprep.subr.bf16.mxu1 %v2043_v0 }
 0x42f   :  { %1687 = vmatpush3.bf16.msra.mxu1 %v1792_v9 }
 0x4e5   :  { %v894_v50 = vpop.f32.mrb[8].mxu1 }
 0x4e6   :  { %v900_v51 = vadd.f32 %v894_v50, %v263_v49  ;;  %v1650_v52 = vpop.f32.mrb[9].mxu1 }
 0x4e7   :  { %v897_v53 = vpop.f32.mrb[10].mxu1 }
 0x4e8   :  { %v907_v55 = vmul.f32 %v2291_v48, %v900_v51  ;;  %v1651_v56 = vpop.f32.mrb[11].mxu1 }
 0x4ea   :  { %v908_v57 = vadd.f32 %v907_v55, %v906_v54 }
 0x4ec   :  { %v910_v58 = vsub.f32 %v908_v57, %v909_v35  ;;  %v1800_v35 = vld [vmem:[#allocation10 + $0x38] sm:$0xff]  }
 0x4ee   :  { %v911_v59 = vsub.f32 %v910_v58, %v905_v32  ;;  %v1028_v20 = vmul.f32 %v2289_v46, %v910_v58  ;;  %v1799_v32 = vld [vmem:[#allocation10 + $0x30] sm:$0xff]  }
 0x4f0   :  { %vm912_vm10 = vcmp.gt.f32.partialorder %v911_v59, 0.0 }
 0x4f1   :  { %v1422_v60 = vsel %vm912_vm10, 1.0, %v2043_v0  ;;  %vm1431_vm11 = vmpackc.low %vm912_vm10, %vm912_vm10 }
 0x4f2   :  { %916 = vst [vmem:[#allocation16 + $0x20] sm:$0xff] %v1422_v60  ;;  %1669 = vmatmul.mubr.msk.bf16.vlgmr.msra.gmra.mrb[16].mxu0 %vm1431_vm11, %v2045_v61  ;;  %v1024_v3 = vmul.f32 %v1422_v60, %v2268_v34 }
 0x4f3   :  { %1708 = vmatprep.mubr.msk.bf16.mxu0 %vm2044_vm0, %v2043_v0  ;;  %1693 = vmatpush3.bf16.msra.mxu0 %v1793_v10 }
 0x4f4   :  { %v1025_v37 = vadd.f32 %v1024_v3, %v1023_v63  ;;  %1694 = vmatprep.subr.bf16.mxu0 %v2043_v0 }
 0x4f6   :  { %v1026_v4 = vmul.f32 1.8, %v1025_v37  ;;  %v1145_v2 = vmul.f32 %v2266_v33, %v1025_v37 }
 0x4f7   :  { %1695 = vmatpush3.bf16.msra.mxu0 %v1794_v11 }
 0x4f8   :  { %v1027_v5 = vadd.f32 0.01, %v1026_v4  ;;  %1696 = vmatprep.subr.bf16.mxu0 %v2043_v0 }
 0x4fa   :  { %v1031_v6 = vmul.f32 %v1422_v60, %v1027_v5 }
 0x4fb   :  { %1697 = vmatpush3.bf16.msra.mxu0 %v1795_v12 }
 0x4fc   :  { %1698 = vmatprep.subr.bf16.mxu0 %v2043_v0 }
 0x4ff   :  { %1699 = vmatpush3.bf16.msra.mxu0 %v1796_v13 }
 0x500   :  { %1700 = vmatprep.subr.bf16.mxu0 %v2043_v0 }
 0x503   :  { %1701 = vmatpush3.bf16.msra.mxu0 %v1797_v14 }
 0x504   :  { %1702 = vmatprep.subr.bf16.mxu0 %v2043_v0 }
 0x507   :  { %1703 = vmatpush3.bf16.msra.mxu0 %v1798_v31 }
 0x508   :  { %1704 = vmatprep.subr.bf16.mxu0 %v2043_v0 }
 0x50b   :  { %1705 = vmatpush3.bf16.msra.mxu0 %v1799_v32 }
 0x50c   :  { %1706 = vmatprep.subr.bf16.mxu0 %v2043_v0 }
 0x50f   :  { %1707 = vmatpush3.bf16.msra.mxu0 %v1800_v35 }
 0x5c5   :  { %v1016_v16 = vpop.f32.mrb[16].mxu0 }
 0x5c6   :  { %v1022_v17 = vadd.f32 %v1016_v16, %v266_v15  ;;  %v1670_v18 = vpop.f32.mrb[17].mxu0 }
 0x5c7   :  { %v1019_v19 = vpop.f32.mrb[18].mxu0 }
 0x5c8   :  { %v1029_v21 = vmul.f32 %v2291_v48, %v1022_v17  ;;  %v1671_v22 = vpop.f32.mrb[19].mxu0 }
 0x5ca   :  { %v1030_v23 = vadd.f32 %v1029_v21, %v1028_v20 }
 0x5cc   :  { %v1032_v24 = vsub.f32 %v1030_v23, %v1031_v6 }
 0x5ce   :  { %v1033_v25 = vsub.f32 %v1032_v24, %v1027_v5  ;;  %v1150_v44 = vmul.f32 %v2289_v46, %v1032_v24 }
 0x5d0   :  { %vm1034_vm12 = vcmp.gt.f32.partialorder %v1033_v25, 0.0 }
 0x5d1   :  { %v1433_v26 = vsel %vm1034_vm12, 1.0, %v2043_v0  ;;  %vm1442_vm13 = vmpackc.low %vm1034_vm12, %vm1034_vm12 }
 0x5d2   :  { %1038 = vst [vmem:[#allocation16 + $0x28] sm:$0xff] %v1433_v26  ;;  %1689 = vmatmul.mubr.msk.bf16.vlgmr.msra.gmra.mrb[12].mxu1 %vm1442_vm13, %v2045_v61  ;;  %v1146_v27 = vmul.f32 %v1433_v26, %v2268_v34 }
 0x5d4   :  { %v1147_v28 = vadd.f32 %v1146_v27, %v1145_v2 }
 0x5d6   :  { %v1148_v39 = vmul.f32 1.8, %v1147_v28  ;;  %v1267_v53 = vmul.f32 %v2266_v33, %v1147_v28 }
 0x5d8   :  { %v1149_v29 = vadd.f32 0.01, %v1148_v39 }
 0x5da   :  { %v1153_v30 = vmul.f32 %v1433_v26, %v1149_v29 }
 0x6a5   :  { %v1138_v38 = vpop.f32.mrb[12].mxu1 }
 0x6a6   :  { %v1144_v40 = vadd.f32 %v1138_v38, %v271_v36  ;;  %v1690_v41 = vpop.f32.mrb[13].mxu1 }
 0x6a7   :  { %v1141_v43 = vpop.f32.mrb[14].mxu1 }
 0x6a8   :  { %v1151_v45 = vmul.f32 %v2291_v48, %v1144_v40  ;;  %v1691_v47 = vpop.f32.mrb[15].mxu1 }
 0x6aa   :  { %v1152_v49 = vadd.f32 %v1151_v45, %v1150_v44 }
 0x6ac   :  { %v1154_v50 = vsub.f32 %v1152_v49, %v1153_v30 }
 0x6ae   :  { %v1155_v51 = vsub.f32 %v1154_v50, %v1149_v29 }
 0x6b0   :  { %vm1156_vm14 = vcmp.gt.f32.partialorder %v1155_v51, 0.0 }
 0x6b1   :  { %v1444_v52 = vsel %vm1156_vm14, 1.0, %v2043_v0  ;;  %vm1453_vm15 = vmpackc.low %vm1156_vm14, %vm1156_vm14 }
 0x6b2   :  { %1160 = vst [vmem:[#allocation16 + $0x30] sm:$0xff] %v1444_v52  ;;  %1709 = vmatmul.mubr.msk.bf16.vlgmr.msra.gmra.mrb[20].mxu0 %vm1453_vm15, %v2045_v61  ;;  %v1268_v62 = vmul.f32 %v1444_v52, %v2268_v34 }
 0x6b4   :  { %v1269_v54 = vadd.f32 %v1268_v62, %v1267_v53 }
 0x6b6   :  { %v1270_v55 = vmul.f32 1.8, %v1269_v54  ;;  %1291 = vst [vmem:[#allocation20] sm:$0xff] %v1269_v54 }
 0x6b8   :  { %v1271_v56 = vadd.f32 0.01, %v1270_v55 }
 0x6ba   :  { %v1275_v57 = vmul.f32 %v1444_v52, %v1271_v56 }
 0x6bb   :  { %1944 = shalt.err (!%p1941_p10)
}
 0x6bc   :  { %s1945_s29 = scalar_lea.hbm %s2487_s14, 128 }
 0x6bd   :  { %p1946_p11 = scmp.ne.s32.totalorder %s2487_s14, %s1945_s29  ;;  %p1949_p12 = scmp.lt.u32.totalorder %s1945_s29, %s2487_s14 }
 0x6bf   :  { %p1951_p13 = pnand %p1949_p12, %p1946_p11 }
 0x6c1   :  { %1954 = shalt.err (!%p1951_p13)
}
 0x6c2   :  { %1333 = dma.vmem_to_hbm [thread:$0]  %s1331_s4, 128, %s2487_s14, [#allocation21]   ;;  %v274_v33 = vadd.f32 %v2304_v1, %v2280_v42  ;;  %v1272_v60 = vmul.f32 %v2289_v46, %v1154_v50 }
 0x6c3   :  { %s2047_s22 = smov [#allocation17]   ;;  %s2048_s1 = smov [#allocation16]  }
 0x6c4   :  { %s1310_s16 = sshll.u32 %s2047_s22, 4  ;;  %s1297_s6 = sshll.u32 %s2048_s1, 4  ;;  %s1311_s16 = int_to_ptr.vmem [resolvable:$true] %s1310_s16  ;;  %s2422_s6 = int_to_ptr.vmem [resolvable:$true] %s1297_s6 }
 0x6c5   :  { %s2049_s14 = smov [#allocation19]   ;;  %s1955_s7 = scalar_lea.vmem %s1311_s16, 128 }
 0x6c6   :  { %s1320_s21 = sshll.u32 %s2049_s14, 4  ;;  %p1956_p0 = scmp.ne.s32.totalorder %s1311_s16, %s1955_s7  ;;  %s2437_s21 = int_to_ptr.vmem [resolvable:$true] %s1320_s21 }
 0x6c7   :  { %p1960_p1 = scmp.lt.s32.totalorder %s1311_s16, %s1311_s16  ;;  %p1961_p2 = scmp.lt.s32.totalorder %s1955_s7, %s1955_s7 }
 0x6c9   :  { %p1962_p3 = por %p1961_p2, %p1960_p1 }
 0x6cb   :  { %p1963_p4 = pnand %p1962_p3, %p1956_p0 }
 0x785   :  { %v1260_v34 = vpop.f32.mrb[20].mxu0 }
 0x786   :  { %v1266_v61 = vadd.f32 %v1260_v34, %v274_v33  ;;  %v1710_v58 = vpop.f32.mrb[21].mxu0 }
 0x787   :  { %v1263_v59 = vpop.f32.mrb[22].mxu0 }
 0x788   :  { %v1273_v63 = vmul.f32 %v2291_v48, %v1266_v61  ;;  %v1711_v3 = vpop.f32.mrb[23].mxu0 }
 0x78a   :  { %v1274_v37 = vadd.f32 %v1273_v63, %v1272_v60 }
 0x78c   :  { %v1276_v4 = vsub.f32 %v1274_v37, %v1275_v57 }
 0x78e   :  { %v1277_v5 = vsub.f32 %v1276_v4, %v1271_v56  ;;  %1289 = vst [vmem:[#allocation17] sm:$0xff] %v1276_v4 }
 0x78f   :  { %1966 = shalt.err (!%p1963_p4)
}
 0x790   :  { %s1967_s30 = scalar_lea.hbm %s2485_s12, 128 }
 0x791   :  { %p1968_p5 = scmp.ne.s32.totalorder %s2485_s12, %s1967_s30  ;;  %p1971_p6 = scmp.lt.u32.totalorder %s1967_s30, %s2485_s12 }
 0x793   :  { %p1973_p7 = pnand %p1971_p6, %p1968_p5 }
 0x795   :  { %1976 = shalt.err (!%p1973_p7)
}
 0x796   :  { %1313 = dma.vmem_to_hbm [thread:$0]  %s1311_s16, 128, %s2485_s12, [#allocation18]   ;;  %vm1278_vm0 = vcmp.gt.f32.partialorder %v1277_v5, 0.0 }
 0x797   :  { %v1455_v42 = vsel %vm1278_vm0, 1.0, %v2043_v0  ;;  %s1977_s3 = scalar_lea.vmem %s2422_s6, 1024  ;;  %p1982_p9 = scmp.lt.s32.totalorder %s2422_s6, %s2422_s6 }
 0x798   :  { %1282 = vst [vmem:[#allocation16 + $0x38] sm:$0xff] %v1455_v42  ;;  %1290 = vst [vmem:[#allocation19] sm:$0xff] %v1455_v42  ;;  %p1978_p8 = scmp.ne.s32.totalorder %s2422_s6, %s1977_s3  ;;  %p1983_p10 = scmp.lt.s32.totalorder %s1977_s3, %s1977_s3 }
 0x79a   :  { %p1984_p11 = por %p1983_p10, %p1982_p9 }
 0x79c   :  { %p1985_p12 = pnand %p1984_p11, %p1978_p8 }
 0x79e   :  { %1988 = shalt.err (!%p1985_p12)
}
 0x79f   :  { %s1989_s25 = scalar_lea.hbm %s2484_s11, 1024 }
 0x7a0   :  { %p1990_p13 = scmp.ne.s32.totalorder %s2484_s11, %s1989_s25  ;;  %p1993_p0 = scmp.lt.u32.totalorder %s1989_s25, %s2484_s11 }
 0x7a2   :  { %p1995_p1 = pnand %p1993_p0, %p1990_p13 }
 0x7a4   :  { %1998 = shalt.err (!%p1995_p1)
}
 0x7a5   :  { %s2050_s18 = smov 128   ;;  %s2051_s19 = smov 8  }
 0x7a6   :  { %1303 = dma.vmem_to_hbm [thread:$0]  %s2422_s6, 1024, %s2484_s11, [#allocation7], %s2050_s18, %s2050_s18, %s2051_s19  }
 0x7a7   :  { %s1999_s20 = scalar_lea.vmem %s2437_s21, 128  ;;  %p2004_p3 = scmp.lt.s32.totalorder %s2437_s21, %s2437_s21 }
 0x7a8   :  { %p2000_p2 = scmp.ne.s32.totalorder %s2437_s21, %s1999_s20  ;;  %p2005_p4 = scmp.lt.s32.totalorder %s1999_s20, %s1999_s20 }
 0x7aa   :  { %p2006_p5 = por %p2005_p4, %p2004_p3 }
 0x7ac   :  { %p2007_p6 = pnand %p2006_p5, %p2000_p2 }
 0x7ae   :  { %2010 = shalt.err (!%p2007_p6)
}
 0x7af   :  { %s2011_s1 = scalar_lea.hbm %s2486_s13, 128 }
 0x7b0   :  { %p2012_p7 = scmp.ne.s32.totalorder %s2486_s13, %s2011_s1  ;;  %p2015_p8 = scmp.lt.u32.totalorder %s2011_s1, %s2486_s13 }
 0x7b2   :  { %p2017_p9 = pnand %p2015_p8, %p2012_p7 }
 0x7b4   :  { %2020 = shalt.err (!%p2017_p9)
}
 0x7b5   :  { %1323 = dma.vmem_to_hbm [thread:$0]  %s2437_s21, 128, %s2486_s13, [#allocation18]  }
 0x7b6   :  { %2029 = dma.done.wait [#allocation7], 1024  }
 0x7b7   :  { %2030 = vsyncadd [#allocation7], 4294966272 }
 0x7b8   :  { %2031 = dma.done.wait [#allocation18], 256  }
 0x7b9   :  { %2032 = vsyncadd [#allocation18], 4294967040 }
 0x7ba   :  { %2033 = dma.done.wait [#allocation21], 128  }
 0x7bb   :  { %2034 = vsyncadd [#allocation21], 4294967168 }
 0x7bc   :  { %1346 = vsyncpa [#allocation6], 1 }
 0x7bd   :  { %1347 = vsyncpa [#allocation9], 1 }
 0x7be   :  { %1348 = vsyncpa [#allocation12], 1 }
 0x7bf   :  { %1349 = vsyncpa [#allocation15], 1 }
 0x7c0   :  { %1350 = vsyncpa [#allocation7], 1 }
 0x7c1   :  { %1351 = vsyncpa [#allocation18], 1 }
 0x7c2   :  { %1352 = vsyncpa [#allocation21], 1 }

</bundles_post_ra>
